<compile_context>
chip_gen: v7x
topology: tpu7x:2x2x1
jax: 0.10.0
libtpu: 0.0.40
codegen_flags: <defaults>
</compile_context>

<pallas_src>
import jax
import jax.numpy as jnp
from jax.experimental import pallas as pl
from jax.experimental.pallas import tpu as pltpu


# ---------------------------------------------------------------------------
# helpers
# ---------------------------------------------------------------------------
def _bytes(shape, dtype):
    n = 1
    for s in shape:
        n *= int(s)
    return n * jnp.dtype(dtype).itemsize


def _compiler_params(block_shapes_dtypes, headroom=6):
    """Explicit VMEM budget: double-buffered blocks + in-kernel temporaries."""
    blocks = sum(_bytes(s, d) for s, d in block_shapes_dtypes)
    need = headroom * blocks
    limit = int(min(max(need, 32 * 1024 * 1024), 120 * 1024 * 1024))
    return pltpu.CompilerParams(
        dimension_semantics=("parallel",),
        vmem_limit_bytes=limit,
    )


# ---------------------------------------------------------------------------
# Kernel 1: fused 1x1 stems + (3x3 max pool -> 1x1 conv)
# ---------------------------------------------------------------------------
def _make_stem_pool_kernel(H, W, c1, c20, c30, c4):
    def kernel(x_ref, ws_ref, bs_ref, w4_ref, b4_ref,
               pa_ref, p2a_ref, p3a_ref):
        # x_ref   : (1, H, W, Cin)        unpadded NHWC activation tile
        # ws_ref  : (Cin, c1+c20+c30)     fused [p1_1 | p2_1 | p3_1] 1x1 weights
        # w4_ref  : (Cin, c4)             1x1 conv applied after the max pool
        # pa_ref  : (1, H*W, c1+c4)       [p1 | p4] passthrough slab
        # p2a_ref : (1, H+2, W+2, c20)    p2_1 output, zero-padded for the 3x3
        # p3a_ref : (1, H+4, W+4, c30)    p3_1 output, zero-padded for the 5x5
        Cin = x_ref.shape[-1]
        dt = pa_ref.dtype
        x = x_ref[...]                                       # (1, H, W, Cin)

        # ---- fused 1x1 stems: one MXU GEMM over all H*W pixels -------------
        x2d = x.reshape(H * W, Cin)
        stem = jnp.dot(x2d, ws_ref[...], preferred_element_type=jnp.float32)
        stem = jnp.maximum(stem + bs_ref[...], 0.0)
        pa_ref[0, :, 0:c1] = stem[:, 0:c1].astype(dt)        # p1 branch

        # ---- 3x3/s1/p1 max pool, separable, -inf halo built in VMEM --------
        # TODO(synk): replace -inf with iinfo(dt).min if integer activations
        #             are ever needed (conv modules are float in practice).
        negc = jnp.full((1, H, 1, Cin), -jnp.inf, x.dtype)
        hmax = jnp.maximum(
            x,
            jnp.maximum(jnp.concatenate([x[:, :, 1:, :], negc], axis=2),
                        jnp.concatenate([negc, x[:, :, :-1, :]], axis=2)))
        negr = jnp.full((1, 1, W, Cin), -jnp.inf, x.dtype)
        m = jnp.maximum(
            hmax,
            jnp.maximum(jnp.concatenate([hmax[:, 1:, :, :], negr], axis=1),
                        jnp.concatenate([negr, hmax[:, :-1, :, :]], axis=1)))

        # ---- 1x1 conv on the pooled tensor (MXU), fused in the same kernel -
        p4 = jnp.dot(m.reshape(H * W, Cin), w4_ref[...],
                     preferred_element_type=jnp.float32)
        p4 = jnp.maximum(p4 + b4_ref[...], 0.0)
        pa_ref[0, :, c1:] = p4.astype(dt)                    # p4 branch

        # ---- reduce branches, written directly in their padded layouts -----
        p2a_ref[...] = jnp.zeros_like(p2a_ref)
        p2a_ref[0, 1:1 + H, 1:1 + W, :] = (
            stem[:, c1:c1 + c20].astype(dt).reshape(H, W, c20))
        p3a_ref[...] = jnp.zeros_like(p3a_ref)
        p3a_ref[0, 2:2 + H, 2:2 + W, :] = (
            stem[:, c1 + c20:c1 + c20 + c30].astype(dt).reshape(H, W, c30))

    return kernel


# ---------------------------------------------------------------------------
# Kernel 2: 3x3 conv + 5x5 conv (grouped per-row GEMMs) + branch merge
# ---------------------------------------------------------------------------
def _make_conv_merge_kernel(H, W, c1, c20, c30, c4):
    def kernel(pa_ref, p2p_ref, p3p_ref, w3_ref, b3_ref, w5_ref, b5_ref, o_ref):
        # pa_ref  : (1, H*W, c1+c4)       [p1 | p4] passthrough
        # p2p_ref : (1, H+2, W+2, c20)    zero padded p2_1 output
        # p3p_ref : (1, H+4, W+4, c30)    zero padded p3_1 output
        # w3_ref  : (3, 3*c20, c21)       per-kernel-row GEMM weights (kh major)
        # w5_ref  : (5, 5*c30, c31)
        # o_ref   : (1, H*W, c1+c21+c31+c4)
        c21 = w3_ref.shape[-1]
        c31 = w5_ref.shape[-1]
        dt = o_ref.dtype

        # ---- 3x3 conv (padding=1): 3 row-grouped GEMMs accumulated in f32 --
        acc2 = jnp.zeros((H * W, c21), jnp.float32)
        for kh in range(3):
            row = jnp.concatenate(
                [p2p_ref[0, kh:kh + H, kw:kw + W, :] for kw in range(3)],
                axis=-1).reshape(H * W, 3 * c20)
            acc2 = acc2 + jnp.dot(row, w3_ref[kh],
                                  preferred_element_type=jnp.float32)
        p2 = jnp.maximum(acc2 + b3_ref[...], 0.0)

        # ---- 5x5 conv (padding=2): 5 row-grouped GEMMs accumulated in f32 --
        acc3 = jnp.zeros((H * W, c31), jnp.float32)
        for kh in range(5):
            row = jnp.concatenate(
                [p3p_ref[0, kh:kh + H, kw:kw + W, :] for kw in range(5)],
                axis=-1).reshape(H * W, 5 * c30)
            acc3 = acc3 + jnp.dot(row, w5_ref[kh],
                                  preferred_element_type=jnp.float32)
        p3 = jnp.maximum(acc3 + b5_ref[...], 0.0)

        # ---- merge [p1 | p2 | p3 | p4]: direct channel-slice stores ---------
        o_ref[0, :, 0:c1] = pa_ref[0, :, 0:c1]
        o_ref[0, :, c1:c1 + c21] = p2.astype(dt)
        o_ref[0, :, c1 + c21:c1 + c21 + c31] = p3.astype(dt)
        o_ref[0, :, c1 + c21 + c31:] = pa_ref[0, :, c1:]

    return kernel


# ---------------------------------------------------------------------------
# Inception module (parameters + forward)
# ---------------------------------------------------------------------------
def init_inception_params(key, in_c, c1, c2, c3, c4):
    ks = jax.random.split(key, 12)

    def conv_p(kw_, kb_, cout, cin, ksize):
        fan_in = cin * ksize * ksize
        bound = 1.0 / (fan_in ** 0.5)
        w = jax.random.uniform(kw_, (cout, cin, ksize, ksize), jnp.float32, -bound, bound)
        b = jax.random.uniform(kb_, (cout,), jnp.float32, -bound, bound)
        return w, b

    return {
        "p1_1": conv_p(ks[0], ks[1], c1, in_c, 1),
        "p2_1": conv_p(ks[2], ks[3], c2[0], in_c, 1),
        "p2_2": conv_p(ks[4], ks[5], c2[1], c2[0], 3),
        "p3_1": conv_p(ks[6], ks[7], c3[0], in_c, 1),
        "p3_2": conv_p(ks[8], ks[9], c3[1], c3[0], 5),
        "p4_2": conv_p(ks[10], ks[11], c4, in_c, 1),
    }


def inception_forward_nhwc(params, x_nhwc):
    """Channels-last forward: (N, H, W, Cin) -> (N, H, W, c1+c2[1]+c3[1]+c4)."""
    w1, b1 = params["p1_1"]
    w21, b21 = params["p2_1"]
    w22, b22 = params["p2_2"]
    w31, b31 = params["p3_1"]
    w32, b32 = params["p3_2"]
    w42, b42 = params["p4_2"]

    N, H, W, Cin = x_nhwc.shape
    c1, c20, c21 = w1.shape[0], w21.shape[0], w22.shape[0]
    c30, c31, c4 = w31.shape[0], w32.shape[0], w42.shape[0]
    Cstem = c1 + c20 + c30
    Ctot = c1 + c21 + c31 + c4
    dt = x_nhwc.dtype

    # -- weights in GEMM form -------------------------------------------------
    def w_1x1(w):                       # (Cout, Cin, 1, 1) -> (Cin, Cout)
        return jnp.transpose(w.reshape(w.shape[0], w.shape[1]), (1, 0))

    def w_rows(w, k):                   # (Cout, Cin, k, k) -> (k, k*Cin, Cout)
        return jnp.transpose(w, (2, 3, 1, 0)).reshape(k, k * w.shape[1], w.shape[0])

    w_stem = jnp.concatenate([w_1x1(w1), w_1x1(w21), w_1x1(w31)], axis=1).astype(dt)
    b_stem = jnp.concatenate([b1, b21, b31]).reshape(1, Cstem).astype(jnp.float32)
    w4 = w_1x1(w42).astype(dt)
    b4 = b42.reshape(1, c4).astype(jnp.float32)
    w3 = w_rows(w22, 3).astype(dt)
    b3 = b22.reshape(1, c21).astype(jnp.float32)
    w5 = w_rows(w32, 5).astype(dt)
    b5 = b32.reshape(1, c31).astype(jnp.float32)

    # -- kernel 1: fused 1x1 stems + (maxpool3x3 -> 1x1 conv) -----------------
    k1_blocks = [((1, H, W, Cin), dt), ((Cin, Cstem), dt), ((1, Cstem), jnp.float32),
                 ((Cin, c4), dt), ((1, c4), jnp.float32),
                 ((1, H * W, c1 + c4), dt), ((1, H + 2, W + 2, c20), dt),
                 ((1, H + 4, W + 4, c30), dt)]
    pa, p2ap, p3ap = pl.pallas_call(
        _make_stem_pool_kernel(H, W, c1, c20, c30, c4),
        out_shape=(jax.ShapeDtypeStruct((N, H * W, c1 + c4), dt),
                   jax.ShapeDtypeStruct((N, H + 2, W + 2, c20), dt),
                   jax.ShapeDtypeStruct((N, H + 4, W + 4, c30), dt)),
        grid=(N,),
        in_specs=[
            pl.BlockSpec((1, H, W, Cin), lambda n: (n, 0, 0, 0)),
            pl.BlockSpec((Cin, Cstem), lambda n: (0, 0)),
            pl.BlockSpec((1, Cstem), lambda n: (0, 0)),
            pl.BlockSpec((Cin, c4), lambda n: (0, 0)),
            pl.BlockSpec((1, c4), lambda n: (0, 0)),
        ],
        out_specs=(
            pl.BlockSpec((1, H * W, c1 + c4), lambda n: (n, 0, 0)),
            pl.BlockSpec((1, H + 2, W + 2, c20), lambda n: (n, 0, 0, 0)),
            pl.BlockSpec((1, H + 4, W + 4, c30), lambda n: (n, 0, 0, 0)),
        ),
        compiler_params=_compiler_params(k1_blocks, headroom=6),
    )(x_nhwc, w_stem, b_stem, w4, b4)

    # -- kernel 2: 3x3 conv + 5x5 conv + branch merge --------------------------
    k2_blocks = [((1, H * W, c1 + c4), dt), ((1, H + 2, W + 2, c20), dt),
                 ((1, H + 4, W + 4, c30), dt), ((3, 3 * c20, c21), dt),
                 ((1, c21), jnp.float32), ((5, 5 * c30, c31), dt),
                 ((1, c31), jnp.float32), ((1, H * W, Ctot), dt)]
    out_flat = pl.pallas_call(
        _make_conv_merge_kernel(H, W, c1, c20, c30, c4),
        out_shape=jax.ShapeDtypeStruct((N, H * W, Ctot), dt),
        grid=(N,),
        in_specs=[
            pl.BlockSpec((1, H * W, c1 + c4), lambda n: (n, 0, 0)),
            pl.BlockSpec((1, H + 2, W + 2, c20), lambda n: (n, 0, 0, 0)),
            pl.BlockSpec((1, H + 4, W + 4, c30), lambda n: (n, 0, 0, 0)),
            pl.BlockSpec((3, 3 * c20, c21), lambda n: (0, 0, 0)),
            pl.BlockSpec((1, c21), lambda n: (0, 0)),
            pl.BlockSpec((5, 5 * c30, c31), lambda n: (0, 0, 0)),
            pl.BlockSpec((1, c31), lambda n: (0, 0)),
        ],
        out_specs=pl.BlockSpec((1, H * W, Ctot), lambda n: (n, 0, 0)),
        compiler_params=_compiler_params(k2_blocks, headroom=8),
    )(pa, p2ap, p3ap, w3, b3, w5, b5)

    return out_flat.reshape(N, H, W, Ctot)


def inception_forward(params, x_nchw):
    """NCHW interface matching the PyTorch module (transposes at the boundary
    only; chain stacked blocks via inception_forward_nhwc to avoid them)."""
    x = jnp.transpose(x_nchw, (0, 2, 3, 1))                  # NCHW -> NHWC
    y = inception_forward_nhwc(params, x)
    return jnp.transpose(y, (0, 3, 1, 2))                    # NHWC -> NCHW


# ---------------------------------------------------------------------------
# Pure-JAX reference (correctness check only)
# ---------------------------------------------------------------------------
def _ref_conv(x, w, b, pad):
    y = jax.lax.conv_general_dilated(
        x, w, (1, 1), [(pad, pad), (pad, pad)],
        dimension_numbers=("NCHW", "OIHW", "NCHW"))
    return jax.nn.relu(y + b.reshape(1, -1, 1, 1))


def inception_ref(params, x):
    p1 = _ref_conv(x, *params["p1_1"], 0)
    p2 = _ref_conv(_ref_conv(x, *params["p2_1"], 0), *params["p2_2"], 1)
    p3 = _ref_conv(_ref_conv(x, *params["p3_1"], 0), *params["p3_2"], 2)
    mp = jax.lax.reduce_window(x, -jnp.inf, jax.lax.max, (1, 1, 3, 3), (1, 1, 1, 1),
                               [(0, 0), (0, 0), (1, 1), (1, 1)])
    p4 = _ref_conv(mp, *params["p4_2"], 0)
    return jnp.concatenate([p1, p2, p3, p4], axis=1)


if __name__ == "__main__":
    key = jax.random.PRNGKey(0)
    k_x, k_p = jax.random.split(key)

    # Inception(in_c=4, c1=8, c2=(4,8), c3=(4,8), c4=8) at small spatial size
    N, in_c, H, W = 2, 4, 16, 16
    c1, c2, c3, c4 = 8, (4, 8), (4, 8), 8

    x = jax.random.normal(k_x, (N, in_c, H, W), jnp.float32)
    params = init_inception_params(k_p, in_c, c1, c2, c3, c4)

    out = jax.block_until_ready(inception_forward(params, x))
    assert out.shape == (N, c1 + c2[1] + c3[1] + c4, H, W), out.shape

    ref = inception_ref(params, x)
    max_err = float(jnp.max(jnp.abs(out - ref)))
    assert jnp.allclose(out, ref, atol=1e-4, rtol=1e-4), max_err

    print("KERNEL_OK")
</pallas_src>

<mosaic_0001>
module attributes {stable_mosaic.version = 11 : i64} {
  func.func @kernel(%arg0: i32, %arg1: memref<1x16x16x4xf32, #tpu.memory_space<vmem>>, %arg2: memref<4x16xf32, #tpu.memory_space<vmem>>, %arg3: memref<1x16xf32, #tpu.memory_space<vmem>>, %arg4: memref<4x8xf32, #tpu.memory_space<vmem>>, %arg5: memref<1x8xf32, #tpu.memory_space<vmem>>, %arg6: memref<1x256x16xf32, #tpu.memory_space<vmem>>, %arg7: memref<1x18x18x4xf32, #tpu.memory_space<vmem>>, %arg8: memref<1x20x20x4xf32, #tpu.memory_space<vmem>>) attributes {dimension_semantics = [#tpu.dimension_semantics<parallel>], iteration_bounds = array<i64: 2>, scalar_prefetch = 0 : i64, scratch_operands = 0 : i64, tpu.core_type = #tpu.core_type<tc>, window_params = [{transform_indices = @transform_0, window_bounds = array<i64: 1, 16, 16, 4>}, {pipeline_mode = #tpu.pipeline_mode<synchronous>, transform_indices = @transform_1, window_bounds = array<i64: 4, 16>}, {pipeline_mode = #tpu.pipeline_mode<synchronous>, transform_indices = @transform_2, window_bounds = array<i64: 1, 16>}, {pipeline_mode = #tpu.pipeline_mode<synchronous>, transform_indices = @transform_3, window_bounds = array<i64: 4, 8>}, {pipeline_mode = #tpu.pipeline_mode<synchronous>, transform_indices = @transform_4, window_bounds = array<i64: 1, 8>}, {transform_indices = @transform_5, window_bounds = array<i64: 1, 256, 16>}, {transform_indices = @transform_6, window_bounds = array<i64: 1, 18, 18, 4>}, {transform_indices = @transform_7, window_bounds = array<i64: 1, 20, 20, 4>}]} {
    %c0 = arith.constant 0 : index
    %c0_0 = arith.constant 0 : index
    %c0_1 = arith.constant 0 : index
    %c0_2 = arith.constant 0 : index
    %0 = vector.load %arg1[%c0, %c0_0, %c0_1, %c0_2] : memref<1x16x16x4xf32, #tpu.memory_space<vmem>>, vector<1x16x16x4xf32>
    %1 = vector.shape_cast %0 : vector<1x16x16x4xf32> to vector<256x4xf32>
    %c0_3 = arith.constant 0 : index
    %c0_4 = arith.constant 0 : index
    %2 = vector.load %arg2[%c0_3, %c0_4] : memref<4x16xf32, #tpu.memory_space<vmem>>, vector<4x16xf32>
    %cst = arith.constant dense<0.000000e+00> : vector<256x16xf32>
    %3 = tpu.matmul %1, %2, %cst {dimension_numbers = #tpu.dot_dimension_numbers<[1], [0], [0], [1], [0, 0, 1, 1], [], []>} : vector<256x4xf32>, vector<4x16xf32>, vector<256x16xf32> -> vector<256x16xf32>
    %c0_5 = arith.constant 0 : index
    %c0_6 = arith.constant 0 : index
    %4 = vector.load %arg3[%c0_5, %c0_6] : memref<1x16xf32, #tpu.memory_space<vmem>>, vector<1x16xf32>
    %5 = vector.broadcast %4 : vector<1x16xf32> to vector<256x16xf32>
    %6 = arith.addf %3, %5 : vector<256x16xf32>
    %cst_7 = arith.constant 0.000000e+00 : f32
    %7 = vector.broadcast %cst_7 : f32 to vector<256x16xf32>
    %8 = arith.maximumf %6, %7 : vector<256x16xf32>
    %9 = vector.extract_strided_slice %8 {offsets = [0, 0], sizes = [256, 8], strides = [1, 1]} : vector<256x16xf32> to vector<256x8xf32>
    %c0_8 = arith.constant 0 : index
    %c0_9 = arith.constant 0 : index
    %c0_10 = arith.constant 0 : index
    %10 = vector.load %arg6[%c0_8, %c0_9, %c0_10] : memref<1x256x16xf32, #tpu.memory_space<vmem>>, vector<1x256x8xf32>
    %11 = vector.shape_cast %10 : vector<1x256x8xf32> to vector<256x8xf32>
    %12 = vector.shape_cast %9 : vector<256x8xf32> to vector<1x256x8xf32>
    tpu.vector_store %arg6[%c0_8, %c0_9, %c0_10], %12 {strides = array<i32>} : memref<1x256x16xf32, #tpu.memory_space<vmem>>, vector<1x256x8xf32>,
    %cst_11 = arith.constant 0xFF800000 : f32
    %13 = vector.broadcast %cst_11 : f32 to vector<1x16x1x4xf32>
    %14 = vector.extract_strided_slice %0 {offsets = [0, 0, 1, 0], sizes = [1, 16, 15, 4], strides = [1, 1, 1, 1]} : vector<1x16x16x4xf32> to vector<1x16x15x4xf32>
    %15 = tpu.concatenate %14, %13 in 2 : vector<1x16x15x4xf32>, vector<1x16x1x4xf32> -> vector<1x16x16x4xf32>
    %16 = vector.extract_strided_slice %0 {offsets = [0, 0, 0, 0], sizes = [1, 16, 15, 4], strides = [1, 1, 1, 1]} : vector<1x16x16x4xf32> to vector<1x16x15x4xf32>
    %17 = tpu.concatenate %13, %16 in 2 : vector<1x16x1x4xf32>, vector<1x16x15x4xf32> -> vector<1x16x16x4xf32>
    %18 = arith.maximumf %15, %17 : vector<1x16x16x4xf32>
    %19 = arith.maximumf %0, %18 : vector<1x16x16x4xf32>
    %cst_12 = arith.constant 0xFF800000 : f32
    %20 = vector.broadcast %cst_12 : f32 to vector<1x1x16x4xf32>
    %21 = vector.extract_strided_slice %19 {offsets = [0, 1, 0, 0], sizes = [1, 15, 16, 4], strides = [1, 1, 1, 1]} : vector<1x16x16x4xf32> to vector<1x15x16x4xf32>
    %22 = tpu.concatenate %21, %20 in 1 : vector<1x15x16x4xf32>, vector<1x1x16x4xf32> -> vector<1x16x16x4xf32>
    %23 = vector.extract_strided_slice %19 {offsets = [0, 0, 0, 0], sizes = [1, 15, 16, 4], strides = [1, 1, 1, 1]} : vector<1x16x16x4xf32> to vector<1x15x16x4xf32>
    %24 = tpu.concatenate %20, %23 in 1 : vector<1x1x16x4xf32>, vector<1x15x16x4xf32> -> vector<1x16x16x4xf32>
    %25 = arith.maximumf %22, %24 : vector<1x16x16x4xf32>
    %26 = arith.maximumf %19, %25 : vector<1x16x16x4xf32>
    %27 = vector.shape_cast %26 : vector<1x16x16x4xf32> to vector<256x4xf32>
    %c0_13 = arith.constant 0 : index
    %c0_14 = arith.constant 0 : index
    %28 = vector.load %arg4[%c0_13, %c0_14] : memref<4x8xf32, #tpu.memory_space<vmem>>, vector<4x8xf32>
    %cst_15 = arith.constant dense<0.000000e+00> : vector<256x8xf32>
    %29 = tpu.matmul %27, %28, %cst_15 {dimension_numbers = #tpu.dot_dimension_numbers<[1], [0], [0], [1], [0, 0, 1, 1], [], []>} : vector<256x4xf32>, vector<4x8xf32>, vector<256x8xf32> -> vector<256x8xf32>
    %c0_16 = arith.constant 0 : index
    %c0_17 = arith.constant 0 : index
    %30 = vector.load %arg5[%c0_16, %c0_17] : memref<1x8xf32, #tpu.memory_space<vmem>>, vector<1x8xf32>
    %31 = vector.broadcast %30 : vector<1x8xf32> to vector<256x8xf32>
    %32 = arith.addf %29, %31 : vector<256x8xf32>
    %cst_18 = arith.constant 0.000000e+00 : f32
    %33 = vector.broadcast %cst_18 : f32 to vector<256x8xf32>
    %34 = arith.maximumf %32, %33 : vector<256x8xf32>
    %c0_19 = arith.constant 0 : index
    %c0_20 = arith.constant 0 : index
    %c8 = arith.constant 8 : index
    %35 = vector.load %arg6[%c0_19, %c0_20, %c8] : memref<1x256x16xf32, #tpu.memory_space<vmem>>, vector<1x256x8xf32>
    %36 = vector.shape_cast %35 : vector<1x256x8xf32> to vector<256x8xf32>
    %37 = vector.shape_cast %34 : vector<256x8xf32> to vector<1x256x8xf32>
    tpu.vector_store %arg6[%c0_19, %c0_20, %c8], %37 {strides = array<i32>} : memref<1x256x16xf32, #tpu.memory_space<vmem>>, vector<1x256x8xf32>,
    %cst_21 = arith.constant 0.000000e+00 : f32
    %38 = vector.broadcast %cst_21 : f32 to vector<1x18x18x4xf32>
    %c0_22 = arith.constant 0 : index
    %c0_23 = arith.constant 0 : index
    %c0_24 = arith.constant 0 : index
    %c0_25 = arith.constant 0 : index
    %39 = vector.load %arg7[%c0_22, %c0_23, %c0_24, %c0_25] : memref<1x18x18x4xf32, #tpu.memory_space<vmem>>, vector<1x18x18x4xf32>
    tpu.vector_store %arg7[%c0_22, %c0_23, %c0_24, %c0_25], %38 {strides = array<i32>} : memref<1x18x18x4xf32, #tpu.memory_space<vmem>>, vector<1x18x18x4xf32>,
    %40 = vector.extract_strided_slice %8 {offsets = [0, 8], sizes = [256, 4], strides = [1, 1]} : vector<256x16xf32> to vector<256x4xf32>
    %41 = vector.shape_cast %40 : vector<256x4xf32> to vector<16x16x4xf32>
    %c0_26 = arith.constant 0 : index
    %c1 = arith.constant 1 : index
    %c1_27 = arith.constant 1 : index
    %c0_28 = arith.constant 0 : index
    %42 = vector.load %arg7[%c0_26, %c1, %c1_27, %c0_28] : memref<1x18x18x4xf32, #tpu.memory_space<vmem>>, vector<1x16x16x4xf32>
    %43 = vector.shape_cast %42 : vector<1x16x16x4xf32> to vector<16x16x4xf32>
    %44 = vector.shape_cast %41 : vector<16x16x4xf32> to vector<1x16x16x4xf32>
    tpu.vector_store %arg7[%c0_26, %c1, %c1_27, %c0_28], %44 {strides = array<i32>} : memref<1x18x18x4xf32, #tpu.memory_space<vmem>>, vector<1x16x16x4xf32>,
    %cst_29 = arith.constant 0.000000e+00 : f32
    %45 = vector.broadcast %cst_29 : f32 to vector<1x20x20x4xf32>
    %c0_30 = arith.constant 0 : index
    %c0_31 = arith.constant 0 : index
    %c0_32 = arith.constant 0 : index
    %c0_33 = arith.constant 0 : index
    %46 = vector.load %arg8[%c0_30, %c0_31, %c0_32, %c0_33] : memref<1x20x20x4xf32, #tpu.memory_space<vmem>>, vector<1x20x20x4xf32>
    tpu.vector_store %arg8[%c0_30, %c0_31, %c0_32, %c0_33], %45 {strides = array<i32>} : memref<1x20x20x4xf32, #tpu.memory_space<vmem>>, vector<1x20x20x4xf32>,
    %47 = vector.extract_strided_slice %8 {offsets = [0, 12], sizes = [256, 4], strides = [1, 1]} : vector<256x16xf32> to vector<256x4xf32>
    %48 = vector.shape_cast %47 : vector<256x4xf32> to vector<16x16x4xf32>
    %c0_34 = arith.constant 0 : index
    %c2 = arith.constant 2 : index
    %c2_35 = arith.constant 2 : index
    %c0_36 = arith.constant 0 : index
    %49 = vector.load %arg8[%c0_34, %c2, %c2_35, %c0_36] : memref<1x20x20x4xf32, #tpu.memory_space<vmem>>, vector<1x16x16x4xf32>
    %50 = vector.shape_cast %49 : vector<1x16x16x4xf32> to vector<16x16x4xf32>
    %51 = vector.shape_cast %48 : vector<16x16x4xf32> to vector<1x16x16x4xf32>
    tpu.vector_store %arg8[%c0_34, %c2, %c2_35, %c0_36], %51 {strides = array<i32>} : memref<1x20x20x4xf32, #tpu.memory_space<vmem>>, vector<1x16x16x4xf32>,
    return
  }
  func.func @transform_0(%arg0: i32) -> (i32, i32, i32, i32) {
    %c0_i32 = arith.constant 0 : i32
    %c0_i32_0 = arith.constant 0 : i32
    %c0_i32_1 = arith.constant 0 : i32
    %c0_i32_2 = arith.constant 0 : i32
    return %arg0, %c0_i32, %c0_i32_0, %c0_i32_1 : i32, i32, i32, i32
  }
  func.func @transform_1(%arg0: i32) -> (i32, i32) {
    %c0_i32 = arith.constant 0 : i32
    %c0_i32_0 = arith.constant 0 : i32
    %c0_i32_1 = arith.constant 0 : i32
    return %c0_i32, %c0_i32_0 : i32, i32
  }
  func.func @transform_2(%arg0: i32) -> (i32, i32) {
    %c0_i32 = arith.constant 0 : i32
    %c0_i32_0 = arith.constant 0 : i32
    %c0_i32_1 = arith.constant 0 : i32
    return %c0_i32, %c0_i32_0 : i32, i32
  }
  func.func @transform_3(%arg0: i32) -> (i32, i32) {
    %c0_i32 = arith.constant 0 : i32
    %c0_i32_0 = arith.constant 0 : i32
    %c0_i32_1 = arith.constant 0 : i32
    return %c0_i32, %c0_i32_0 : i32, i32
  }
  func.func @transform_4(%arg0: i32) -> (i32, i32) {
    %c0_i32 = arith.constant 0 : i32
    %c0_i32_0 = arith.constant 0 : i32
    %c0_i32_1 = arith.constant 0 : i32
    return %c0_i32, %c0_i32_0 : i32, i32
  }
  func.func @transform_5(%arg0: i32) -> (i32, i32, i32) {
    %c0_i32 = arith.constant 0 : i32
    %c0_i32_0 = arith.constant 0 : i32
    %c0_i32_1 = arith.constant 0 : i32
    return %arg0, %c0_i32, %c0_i32_0 : i32, i32, i32
  }
  func.func @transform_6(%arg0: i32) -> (i32, i32, i32, i32) {
    %c0_i32 = arith.constant 0 : i32
    %c0_i32_0 = arith.constant 0 : i32
    %c0_i32_1 = arith.constant 0 : i32
    %c0_i32_2 = arith.constant 0 : i32
    return %arg0, %c0_i32, %c0_i32_0, %c0_i32_1 : i32, i32, i32, i32
  }
  func.func @transform_7(%arg0: i32) -> (i32, i32, i32, i32) {
    %c0_i32 = arith.constant 0 : i32
    %c0_i32_0 = arith.constant 0 : i32
    %c0_i32_1 = arith.constant 0 : i32
    %c0_i32_2 = arith.constant 0 : i32
    return %arg0, %c0_i32, %c0_i32_0, %c0_i32_1 : i32, i32, i32, i32
  }
}

</mosaic_0001>

<bundles_post_ra>
// kernel: tpu_custom_call.1
= control target key start
LH: loop header
LB: loop body
LE: loop exit
PB: predicated region body
PF: predicated region fallthrough
CT: control target
= control target key end

     0   :  { %s2484_s24 = smov 0   ;;  %s3767_s0 = inlined_call_operand.vmem [shape: f32[2,16,16,4], index: 0, kind: input, shape index: {}]   ;;  %s3768_s1 = inlined_call_operand.vmem [shape: f32[4,16], index: 1, kind: input, shape index: {}]   ;;  %s3769_s2 = inlined_call_operand.vmem [shape: f32[1,16], index: 2, kind: input, shape index: {}]   ;;  %s3770_s3 = inlined_call_operand.vmem [shape: f32[4,8], index: 3, kind: input, shape index: {}]   ;;  %s3771_s4 = inlined_call_operand.vmem [shape: f32[1,8], index: 4, kind: input, shape index: {}]   ;;  %s3772_s5 = inlined_call_operand.vmem [shape: f32[2,256,16], index: 5, kind: output, shape index: {0}]   ;;  %s3773_s6 = inlined_call_operand.vmem [shape: f32[2,18,18,4], index: 6, kind: output, shape index: {1}]   ;;  %s3774_s7 = inlined_call_operand.vmem [shape: f32[2,20,20,4], index: 7, kind: output, shape index: {2}]  }
   0x1 LB: > { %s2105_s25 = sadd.s32 4294967295, %s2438_s24   ;;  %p2109_p0 = scmp.ge.s32.totalorder %s2438_s24, 1  ;;  %s2438_s24 = sphi %s2484_s24, %s18_s24  }
   0x2   : > { %p242_p1 = scmp.lt.s32.totalorder %s2438_s24, 3 }
   0x4   : > { %p243_p2 = pnand %p2109_p0, %p242_p1 }
   0x5   : > { %v336_v0 = vld [vmem:[%s3768_s1] sm:$0xf] (!%p243_p2)  ;;  %vm441_vm0 = vcmask (!%p243_p2), 1043456   ;;  %p284_p3 = scmp.lt.s32.totalorder (!%p243_p2), %s2105_s25, 1  ;;  %vm344_vm1 = vcmask (!%p243_p2), 31744   ;;  %vm735_vm2 = vcmask (!%p243_p2), 1046528  }
   0x6   : > { %246 = sbr.rel (%p243_p2) target bundleno = 539 (0x21b), region = 40  ;;  %2318 = vmatprep.subr.msk.mxu0 (!%p243_p2), %vm441_vm0, %v336_v0  ;;  %v1053_v1 = vld [vmem:[%s3770_s3] sm:$0xf] (!%p243_p2)  ;;  %vm832_vm3 = vcmask (!%p243_p2), 1040384   ;;  %vm1580_vm4 = vcmask (!%p243_p2), 25600   ;;  %vm1796_vm5 = vcmask (!%p243_p2), 27648  }
   0x7   : > { %2319 = vmatpush3.msk.msra.mxu0 (!%p243_p2), %vm441_vm0, %v336_v0  ;;  %2368 = vmatprep.subr.msk.mxu1 (!%p243_p2), %vm441_vm0, %v1053_v1  ;;  %vm702_vm6 = vcmask (!%p243_p2), 64512   ;;  %s2441_s26 = smov (!%p243_p2), 120   ;;  %s2443_s29 = smov (!%p243_p2), 8   ;;  %vm1545_vm7 = vcmask (!%p243_p2), 130112  }
   0x8   : > { %2369 = vmatpush3.msk.msra.mxu1 (!%p243_p2), %vm441_vm0, %v1053_v1 }
   0xd   : > { %s3776_s25 = smov (!%p284_p3, %s2105_s25), 1 }
   0xe   : > { %s2250_s30 = sshll.u32 %s3776_s25, 8  ;;  %s2418_s11 = smul.u32 432, %s3776_s25 }
   0xf   : > { %s2506_s10 = scalar_lea.vmem %s3767_s0, %s2250_s30  ;;  %s2419_s12 = smul.u32 480, %s3776_s25 }
  0x10   : > { %v304_v2 = vld [vmem:[%s2506_s10] sm:$0xff]  ;;  %v305_v3 = vld [vmem:[%s2506_s10 + $0x8] sm:$0xff]  ;;  %v306_v4 = vld [vmem:[%s2506_s10 + $0x10] sm:$0xff]  ;;  %s2773_s15 = scalar_lea.vmem %s3773_s6, %s2418_s11  ;;  %s3133_s23 = scalar_lea.vmem %s3772_s5, %s2250_s30 }
  0x11   : > { %2320 = vmatprep.mubr.msk.f32.mxu0 %vm344_vm1, %v304_v2  ;;  %v736_v5 = vrot.slane %v304_v2, 1  ;;  %v833_v6 = vrot.slane %v304_v2, 7  ;;  %v737_v7 = vrot.slane %v305_v3, 1  ;;  %v834_v8 = vrot.slane %v305_v3, 7  ;;  %v307_v9 = vld [vmem:[%s2506_s10 + $0x18] sm:$0xff]  ;;  %v308_v14 = vld [vmem:[%s2506_s10 + $0x20] sm:$0xff]  ;;  %s2778_s18 = scalar_lea.vmem %s3774_s7, %s2419_s12 }
  0x12   : > { %2321 = vmatmul.mubr.msk.f32.vlgmr.msra.gmra.mrb[0].mxu0 %vm344_vm1, %v305_v3  ;;  %v739_v10 = vrot.slane %v306_v4, 1  ;;  %v836_v11 = vrot.slane %v306_v4, 7  ;;  %v740_v12 = vrot.slane %v307_v9, 1  ;;  %v837_v13 = vrot.slane %v307_v9, 7  ;;  %v309_v27 = vld [vmem:[%s2506_s10 + $0x28] sm:$0xff]  ;;  %v310_v32 = vld [vmem:[%s2506_s10 + $0x30] sm:$0xff] }
  0x13   : > { %v816_v15 = vsel %vm735_vm2, %v737_v7, -inf  ;;  %v835_v16 = vsel %vm832_vm3, %v833_v6, %v834_v8  ;;  %2323 = vmatprep.mubr.msk.f32.mxu0 %vm344_vm1, %v306_v4  ;;  %v742_v17 = vrot.slane %v308_v14, 1  ;;  %v839_v18 = vrot.slane %v308_v14, 7  ;;  %v311_v45 = vld [vmem:[%s2506_s10 + $0x38] sm:$0xff]  ;;  %v312_v50 = vld [vmem:[%s2506_s10 + $0x40] sm:$0xff]  ;;  %v313_v63 = vld [vmem:[%s2506_s10 + $0x48] sm:$0xff] }
  0x14   : > { %v930_v19 = vmax.f32 %v816_v15, %v835_v16  ;;  %v817_v20 = vsel %vm735_vm2, %v740_v12, -inf  ;;  %v838_v21 = vsel %vm832_vm3, %v836_v11, %v837_v13  ;;  %v738_v22 = vsel %vm735_vm2, %v736_v5, %v737_v7  ;;  %v314_v0 = vld [vmem:[%s2506_s10 + $0x50] sm:$0xff]  ;;  %s2442_s25 = smov 116  }
  0x15   : > { %v932_v23 = vmax.f32 %v817_v20, %v838_v21  ;;  %v915_v24 = vsel %vm832_vm3, -inf, %v839_v18  ;;  %v741_v25 = vsel %vm735_vm2, %v739_v10, %v740_v12  ;;  %v913_v26 = vsel %vm832_vm3, -inf, %v833_v6 }
  0x16   : > { %v962_v28 = vmax.f32 %v305_v3, %v930_v19  ;;  %2324 = vmatmul.mubr.msk.f32.gmra.mrb[2].mxu0 %vm344_vm1, %v307_v9  ;;  %v914_v29 = vsel %vm832_vm3, -inf, %v836_v11  ;;  %v929_v30 = vmax.f32 %v738_v22, %v913_v26  ;;  %v743_v31 = vrot.slane %v309_v27, 1 }
  0x17   : > { %v2528_v33 = vmax.f32 %v307_v9, %v932_v23  ;;  %2326 = vmatprep.mubr.msk.f32.mxu0 %vm344_vm1, %v308_v14  ;;  %v931_v34 = vmax.f32 %v741_v25, %v914_v29  ;;  %v840_v35 = vrot.slane %v309_v27, 7  ;;  %v745_v36 = vrot.slane %v310_v32, 1 }
  0x18   : > { %v961_v37 = vmax.f32 %v304_v2, %v929_v30  ;;  %v744_v38 = vsel %vm735_vm2, %v742_v17, %v743_v31  ;;  %v818_v39 = vsel %vm735_vm2, %v743_v31, -inf  ;;  %v842_v40 = vrot.slane %v310_v32, 7  ;;  %v315_v17 = vld [vmem:[%s2506_s10 + $0x58] sm:$0xff] }
  0x19   : > { %v963_v41 = vmax.f32 %v306_v4, %v931_v34  ;;  %v841_v42 = vsel %vm832_vm3, %v839_v18, %v840_v35  ;;  %v933_v43 = vmax.f32 %v744_v38, %v915_v24  ;;  %v1022_v44 = vmax.f32 %v962_v28, %v2528_v33  ;;  %v316_v18 = vld [vmem:[%s2506_s10 + $0x60] sm:$0xff]  ;;  %v317_v35 = vld [vmem:[%s2506_s10 + $0x68] sm:$0xff] }
  0x1a   : > { %2327 = vmatmul.mubr.msk.f32.gmra.mrb[4].mxu0 %vm344_vm1, %v309_v27  ;;  %v934_v46 = vmax.f32 %v818_v39, %v841_v42  ;;  %v916_v47 = vsel %vm832_vm3, -inf, %v842_v40  ;;  %v746_v48 = vrot.slane %v311_v45, 1  ;;  %v843_v49 = vrot.slane %v311_v45, 7 }
  0x1b   : > { %v1021_v51 = vmax.f32 %v961_v37, %v963_v41  ;;  %2329 = vmatprep.mubr.msk.f32.mxu0 %vm344_vm1, %v310_v32  ;;  %v2540_v52 = vmax.f32 %v308_v14, %v933_v43  ;;  %v748_v53 = vrot.slane %v312_v50, 1  ;;  %v845_v54 = vrot.slane %v312_v50, 7 }
  0x1c   : > { %v2542_v55 = vmax.f32 %v309_v27, %v934_v46  ;;  %v747_v56 = vsel %vm735_vm2, %v745_v36, %v746_v48  ;;  %v819_v57 = vsel %vm735_vm2, %v746_v48, -inf  ;;  %v844_v58 = vsel %vm832_vm3, %v842_v40, %v843_v49  ;;  %v318_v36 = vld [vmem:[%s2506_s10 + $0x70] sm:$0xff] }
  0x1d   : > { %2370 = vmatprep.mubr.msk.f32.mxu1 %vm344_vm1, %v1021_v51  ;;  %v935_v59 = vmax.f32 %v747_v56, %v916_v47  ;;  %v936_v60 = vmax.f32 %v819_v57, %v844_v58  ;;  %v993_v61 = vmax.f32 %v2540_v52, %v961_v37  ;;  %v917_v62 = vsel %vm832_vm3, -inf, %v845_v54 }
  0x1e   : > { %2371 = vmatmul.mubr.msk.f32.vlgmr.msra.gmra.mrb[0].mxu1 %vm344_vm1, %v1022_v44  ;;  %2330 = vmatmul.mubr.msk.f32.gmra.mrb[6].mxu0 %vm344_vm1, %v311_v45  ;;  %v994_v1 = vmax.f32 %v2542_v55, %v962_v28  ;;  %v749_v2 = vrot.slane %v313_v63, 1  ;;  %v846_v3 = vrot.slane %v313_v63, 7  ;;  %v751_v4 = vrot.slane %v314_v0, 1 }
  0x1f   : > { %v2555_v5 = vmax.f32 %v311_v45, %v936_v60  ;;  %v1023_v6 = vmax.f32 %v963_v41, %v993_v61  ;;  %2332 = vmatprep.mubr.msk.f32.mxu0 %vm344_vm1, %v312_v50  ;;  %v2558_v7 = vmax.f32 %v310_v32, %v935_v59  ;;  %v848_v8 = vrot.slane %v314_v0, 7 }
  0x20   : > { %v1024_v9 = vmax.f32 %v2528_v33, %v994_v1  ;;  %v750_v10 = vsel %vm735_vm2, %v748_v53, %v749_v2  ;;  %v820_v11 = vsel %vm735_vm2, %v749_v2, -inf  ;;  %v847_v12 = vsel %vm832_vm3, %v845_v54, %v846_v3  ;;  %v319_v53 = vld [vmem:[%s2506_s10 + $0x78] sm:$0xff]  ;;  %v320_v54 = vld [vmem:[%s2506_s10 + $0x80] sm:$0xff] }
  0x21   : > { %2373 = vmatprep.mubr.msk.f32.mxu1 %vm344_vm1, %v1023_v6  ;;  %v937_v13 = vmax.f32 %v750_v10, %v917_v62  ;;  %v938_v14 = vmax.f32 %v820_v11, %v847_v12  ;;  %v995_v15 = vmax.f32 %v2558_v7, %v963_v41  ;;  %v996_v16 = vmax.f32 %v2555_v5, %v2528_v33 }
  0x22   : > { %2374 = vmatmul.mubr.msk.f32.gmra.mrb[2].mxu1 %vm344_vm1, %v1024_v9  ;;  %2333 = vmatmul.mubr.msk.f32.gmra.mrb[8].mxu0 %vm344_vm1, %v313_v63  ;;  %v918_v19 = vsel %vm832_vm3, -inf, %v848_v8  ;;  %v752_v20 = vrot.slane %v315_v17, 1  ;;  %v849_v21 = vrot.slane %v315_v17, 7  ;;  %v754_v22 = vrot.slane %v316_v18, 1 }
  0x23   : > { %v2573_v23 = vmax.f32 %v313_v63, %v938_v14  ;;  %v1025_v24 = vmax.f32 %v2540_v52, %v995_v15  ;;  %v1026_v25 = vmax.f32 %v2542_v55, %v996_v16  ;;  %2335 = vmatprep.mubr.msk.f32.mxu0 %vm344_vm1, %v314_v0  ;;  %v2578_v26 = vmax.f32 %v312_v50, %v937_v13 }
  0x24   : > { %v753_v27 = vsel %vm735_vm2, %v751_v4, %v752_v20  ;;  %v821_v28 = vsel %vm735_vm2, %v752_v20, -inf  ;;  %v850_v29 = vsel %vm832_vm3, %v848_v8, %v849_v21  ;;  %v851_v30 = vrot.slane %v316_v18, 7  ;;  %v322_v8 = vld [vmem:[%s2506_s10 + $0x90] sm:$0xff] }
  0x25   : > { %2376 = vmatprep.mubr.msk.f32.mxu1 %vm344_vm1, %v1025_v24  ;;  %v939_v31 = vmax.f32 %v753_v27, %v918_v19  ;;  %v940_v32 = vmax.f32 %v821_v28, %v850_v29  ;;  %v997_v33 = vmax.f32 %v2578_v26, %v2540_v52  ;;  %v998_v34 = vmax.f32 %v2573_v23, %v2542_v55 }
  0x26   : > { %2377 = vmatmul.mubr.msk.f32.gmra.mrb[4].mxu1 %vm344_vm1, %v1026_v25  ;;  %2336 = vmatmul.mubr.msk.f32.gmra.mrb[10].mxu0 %vm344_vm1, %v315_v17  ;;  %v919_v37 = vsel %vm832_vm3, -inf, %v851_v30  ;;  %v755_v38 = vrot.slane %v317_v35, 1  ;;  %v852_v39 = vrot.slane %v317_v35, 7  ;;  %v757_v40 = vrot.slane %v318_v36, 1  ;;  %v323_v25 = vld [vmem:[%s2506_s10 + $0x98] sm:$0xff] }
  0x27   : > { %v2593_v41 = vmax.f32 %v315_v17, %v940_v32  ;;  %v1027_v42 = vmax.f32 %v2558_v7, %v997_v33  ;;  %v1028_v43 = vmax.f32 %v2555_v5, %v998_v34  ;;  %2338 = vmatprep.mubr.msk.f32.mxu0 %vm344_vm1, %v316_v18  ;;  %v2598_v44 = vmax.f32 %v314_v0, %v939_v31 }
  0x28   : > { %v756_v45 = vsel %vm735_vm2, %v754_v22, %v755_v38  ;;  %v822_v46 = vsel %vm735_vm2, %v755_v38, -inf  ;;  %v853_v47 = vsel %vm832_vm3, %v851_v30, %v852_v39  ;;  %v854_v48 = vrot.slane %v318_v36, 7 }
  0x29   : > { %2379 = vmatprep.mubr.msk.f32.mxu1 %vm344_vm1, %v1027_v42  ;;  %v941_v49 = vmax.f32 %v756_v45, %v919_v37  ;;  %v942_v50 = vmax.f32 %v822_v46, %v853_v47  ;;  %v999_v51 = vmax.f32 %v2598_v44, %v2558_v7  ;;  %v1000_v52 = vmax.f32 %v2593_v41, %v2555_v5  ;;  %v321_v7 = vld [vmem:[%s2506_s10 + $0x88] sm:$0xff] }
  0x2a   : > { %2380 = vmatmul.mubr.msk.f32.gmra.mrb[6].mxu1 %vm344_vm1, %v1028_v43  ;;  %2339 = vmatmul.mubr.msk.f32.gmra.mrb[12].mxu0 %vm344_vm1, %v317_v35  ;;  %v920_v55 = vsel %vm832_vm3, -inf, %v854_v48  ;;  %v758_v56 = vrot.slane %v319_v53, 1  ;;  %v855_v57 = vrot.slane %v319_v53, 7  ;;  %v760_v58 = vrot.slane %v320_v54, 1  ;;  %v325_v43 = vld [vmem:[%s2506_s10 + $0xa8] sm:$0xff] }
  0x2b   : > { %v2613_v59 = vmax.f32 %v317_v35, %v942_v50  ;;  %v1029_v60 = vmax.f32 %v2578_v26, %v999_v51  ;;  %v1030_v61 = vmax.f32 %v2573_v23, %v1000_v52  ;;  %2341 = vmatprep.mubr.msk.f32.mxu0 %vm344_vm1, %v318_v36  ;;  %v2618_v62 = vmax.f32 %v316_v18, %v941_v49 }
  0x2c   : > { %v759_v63 = vsel %vm735_vm2, %v757_v40, %v758_v56  ;;  %v823_v0 = vsel %vm735_vm2, %v758_v56, -inf  ;;  %v856_v1 = vsel %vm832_vm3, %v854_v48, %v855_v57  ;;  %v857_v2 = vrot.slane %v320_v54, 7 }
  0x2d   : > { %2382 = vmatprep.mubr.msk.f32.mxu1 %vm344_vm1, %v1029_v60  ;;  %v943_v3 = vmax.f32 %v759_v63, %v920_v55  ;;  %v944_v4 = vmax.f32 %v823_v0, %v856_v1  ;;  %v1001_v5 = vmax.f32 %v2618_v62, %v2578_v26  ;;  %v1002_v6 = vmax.f32 %v2613_v59, %v2573_v23  ;;  %v324_v26 = vld [vmem:[%s2506_s10 + $0xa0] sm:$0xff] }
  0x2e   : > { %2383 = vmatmul.mubr.msk.f32.gmra.mrb[8].mxu1 %vm344_vm1, %v1030_v61  ;;  %2342 = vmatmul.mubr.msk.f32.gmra.mrb[14].mxu0 %vm344_vm1, %v319_v53  ;;  %v921_v9 = vsel %vm832_vm3, -inf, %v857_v2  ;;  %v761_v10 = vrot.slane %v321_v7, 1  ;;  %v858_v11 = vrot.slane %v321_v7, 7  ;;  %v763_v12 = vrot.slane %v322_v8, 1  ;;  %v327_v61 = vld [vmem:[%s2506_s10 + $0xb8] sm:$0xff] }
  0x2f   : > { %v2633_v13 = vmax.f32 %v319_v53, %v944_v4  ;;  %v1031_v14 = vmax.f32 %v2598_v44, %v1001_v5  ;;  %v1032_v15 = vmax.f32 %v2593_v41, %v1002_v6  ;;  %2344 = vmatprep.mubr.msk.f32.mxu0 %vm344_vm1, %v320_v54  ;;  %v2638_v16 = vmax.f32 %v318_v36, %v943_v3 }
  0x30   : > { %v762_v17 = vsel %vm735_vm2, %v760_v58, %v761_v10  ;;  %v824_v18 = vsel %vm735_vm2, %v761_v10, -inf  ;;  %v859_v19 = vsel %vm832_vm3, %v857_v2, %v858_v11  ;;  %v860_v20 = vrot.slane %v322_v8, 7 }
  0x31   : > { %2385 = vmatprep.mubr.msk.f32.mxu1 %vm344_vm1, %v1031_v14  ;;  %v945_v21 = vmax.f32 %v762_v17, %v921_v9  ;;  %v946_v22 = vmax.f32 %v824_v18, %v859_v19  ;;  %v1003_v23 = vmax.f32 %v2638_v16, %v2598_v44  ;;  %v1004_v24 = vmax.f32 %v2633_v13, %v2593_v41  ;;  %v326_v44 = vld [vmem:[%s2506_s10 + $0xb0] sm:$0xff] }
  0x32   : > { %2386 = vmatmul.mubr.msk.f32.gmra.mrb[10].mxu1 %vm344_vm1, %v1032_v15  ;;  %2345 = vmatmul.mubr.msk.f32.gmra.mrb[16].mxu0 %vm344_vm1, %v321_v7  ;;  %v922_v27 = vsel %vm832_vm3, -inf, %v860_v20  ;;  %v764_v28 = vrot.slane %v323_v25, 1  ;;  %v861_v29 = vrot.slane %v323_v25, 7  ;;  %v766_v30 = vrot.slane %v324_v26, 1  ;;  %v329_v15 = vld [vmem:[%s2506_s10 + $0xc8] sm:$0xff] }
  0x33   : > { %v2653_v31 = vmax.f32 %v321_v7, %v946_v22  ;;  %v1033_v32 = vmax.f32 %v2618_v62, %v1003_v23  ;;  %v1034_v33 = vmax.f32 %v2613_v59, %v1004_v24  ;;  %2347 = vmatprep.mubr.msk.f32.mxu0 %vm344_vm1, %v322_v8  ;;  %v2658_v34 = vmax.f32 %v320_v54, %v945_v21 }
  0x34   : > { %v765_v35 = vsel %vm735_vm2, %v763_v12, %v764_v28  ;;  %v825_v36 = vsel %vm735_vm2, %v764_v28, -inf  ;;  %v862_v37 = vsel %vm832_vm3, %v860_v20, %v861_v29  ;;  %v863_v38 = vrot.slane %v324_v26, 7 }
  0x35   : > { %2388 = vmatprep.mubr.msk.f32.mxu1 %vm344_vm1, %v1033_v32  ;;  %v947_v39 = vmax.f32 %v765_v35, %v922_v27  ;;  %v948_v40 = vmax.f32 %v825_v36, %v862_v37  ;;  %v1005_v41 = vmax.f32 %v2658_v34, %v2618_v62  ;;  %v1006_v42 = vmax.f32 %v2653_v31, %v2613_v59  ;;  %v328_v62 = vld [vmem:[%s2506_s10 + $0xc0] sm:$0xff] }
  0x36   : > { %2389 = vmatmul.mubr.msk.f32.gmra.mrb[12].mxu1 %vm344_vm1, %v1034_v33  ;;  %2348 = vmatmul.mubr.msk.f32.gmra.mrb[18].mxu0 %vm344_vm1, %v323_v25  ;;  %v923_v45 = vsel %vm832_vm3, -inf, %v863_v38  ;;  %v767_v46 = vrot.slane %v325_v43, 1  ;;  %v864_v47 = vrot.slane %v325_v43, 7  ;;  %v769_v48 = vrot.slane %v326_v44, 1  ;;  %v331_v33 = vld [vmem:[%s2506_s10 + $0xd8] sm:$0xff] }
  0x37   : > { %v2673_v49 = vmax.f32 %v323_v25, %v948_v40  ;;  %v1035_v50 = vmax.f32 %v2638_v16, %v1005_v41  ;;  %v1036_v51 = vmax.f32 %v2633_v13, %v1006_v42  ;;  %2350 = vmatprep.mubr.msk.f32.mxu0 %vm344_vm1, %v324_v26  ;;  %v2678_v52 = vmax.f32 %v322_v8, %v947_v39 }
  0x38   : > { %v768_v53 = vsel %vm735_vm2, %v766_v30, %v767_v46  ;;  %v826_v54 = vsel %vm735_vm2, %v767_v46, -inf  ;;  %v865_v55 = vsel %vm832_vm3, %v863_v38, %v864_v47  ;;  %v866_v56 = vrot.slane %v326_v44, 7 }
  0x39   : > { %2391 = vmatprep.mubr.msk.f32.mxu1 %vm344_vm1, %v1035_v50  ;;  %v949_v57 = vmax.f32 %v768_v53, %v923_v45  ;;  %v950_v58 = vmax.f32 %v826_v54, %v865_v55  ;;  %v1007_v59 = vmax.f32 %v2678_v52, %v2638_v16  ;;  %v1008_v60 = vmax.f32 %v2673_v49, %v2633_v13  ;;  %v330_v16 = vld [vmem:[%s2506_s10 + $0xd0] sm:$0xff] }
  0x3a   : > { %2392 = vmatmul.mubr.msk.f32.gmra.mrb[14].mxu1 %vm344_vm1, %v1036_v51  ;;  %2351 = vmatmul.mubr.msk.f32.gmra.mrb[20].mxu0 %vm344_vm1, %v325_v43  ;;  %v924_v63 = vsel %vm832_vm3, -inf, %v866_v56  ;;  %v770_v0 = vrot.slane %v327_v61, 1  ;;  %v867_v1 = vrot.slane %v327_v61, 7  ;;  %v772_v2 = vrot.slane %v328_v62, 1 }
  0x3b   : > { %v2693_v3 = vmax.f32 %v325_v43, %v950_v58  ;;  %v1037_v4 = vmax.f32 %v2658_v34, %v1007_v59  ;;  %v1038_v5 = vmax.f32 %v2653_v31, %v1008_v60  ;;  %2353 = vmatprep.mubr.msk.f32.mxu0 %vm344_vm1, %v326_v44  ;;  %v2698_v6 = vmax.f32 %v324_v26, %v949_v57  ;;  %v334_v43 = vld [vmem:[%s2506_s10 + $0xf0] sm:$0xff] }
  0x3c   : > { %v771_v7 = vsel %vm735_vm2, %v769_v48, %v770_v0  ;;  %v827_v8 = vsel %vm735_vm2, %v770_v0, -inf  ;;  %v868_v9 = vsel %vm832_vm3, %v866_v56, %v867_v1  ;;  %v869_v10 = vrot.slane %v328_v62, 7 }
  0x3d   : > { %2394 = vmatprep.mubr.msk.f32.mxu1 %vm344_vm1, %v1037_v4  ;;  %v951_v11 = vmax.f32 %v771_v7, %v924_v63  ;;  %v952_v12 = vmax.f32 %v827_v8, %v868_v9  ;;  %v1009_v13 = vmax.f32 %v2698_v6, %v2658_v34  ;;  %v1010_v14 = vmax.f32 %v2693_v3, %v2653_v31  ;;  %v332_v34 = vld [vmem:[%s2506_s10 + $0xe0] sm:$0xff] }
  0x3e   : > { %2395 = vmatmul.mubr.msk.f32.gmra.mrb[16].mxu1 %vm344_vm1, %v1038_v5  ;;  %2354 = vmatmul.mubr.msk.f32.gmra.mrb[22].mxu0 %vm344_vm1, %v327_v61  ;;  %v925_v17 = vsel %vm832_vm3, -inf, %v869_v10  ;;  %v773_v18 = vrot.slane %v329_v15, 1  ;;  %v870_v19 = vrot.slane %v329_v15, 7  ;;  %v775_v20 = vrot.slane %v330_v16, 1 }
  0x3f   : > { %v2713_v21 = vmax.f32 %v327_v61, %v952_v12  ;;  %v1039_v22 = vmax.f32 %v2678_v52, %v1009_v13  ;;  %v1040_v23 = vmax.f32 %v2673_v49, %v1010_v14  ;;  %2356 = vmatprep.mubr.msk.f32.mxu0 %vm344_vm1, %v328_v62  ;;  %v983_v24 = vmax.f32 %v326_v44, %v951_v11  ;;  %v335_v61 = vld [vmem:[%s2506_s10 + $0xf8] sm:$0xff] }
  0x40   : > { %v774_v25 = vsel %vm735_vm2, %v772_v2, %v773_v18  ;;  %v828_v26 = vsel %vm735_vm2, %v773_v18, -inf  ;;  %v871_v27 = vsel %vm832_vm3, %v869_v10, %v870_v19  ;;  %v872_v28 = vrot.slane %v330_v16, 7 }
  0x41   : > { %2397 = vmatprep.mubr.msk.f32.mxu1 %vm344_vm1, %v1039_v22  ;;  %v953_v29 = vmax.f32 %v774_v25, %v925_v17  ;;  %v954_v30 = vmax.f32 %v828_v26, %v871_v27  ;;  %v1011_v31 = vmax.f32 %v983_v24, %v2678_v52  ;;  %v1012_v32 = vmax.f32 %v2713_v21, %v2673_v49  ;;  %v333_v52 = vld [vmem:[%s2506_s10 + $0xe8] sm:$0xff] }
  0x42   : > { %2398 = vmatmul.mubr.msk.f32.gmra.mrb[18].mxu1 %vm344_vm1, %v1040_v23  ;;  %2357 = vmatmul.mubr.msk.f32.gmra.mrb[24].mxu0 %vm344_vm1, %v329_v15  ;;  %v926_v35 = vsel %vm832_vm3, -inf, %v872_v28  ;;  %v776_v36 = vrot.slane %v331_v33, 1  ;;  %v873_v37 = vrot.slane %v331_v33, 7  ;;  %v778_v38 = vrot.slane %v332_v34, 1 }
  0x43   : > { %v986_v39 = vmax.f32 %v329_v15, %v954_v30  ;;  %v1041_v40 = vmax.f32 %v2698_v6, %v1011_v31  ;;  %v1042_v41 = vmax.f32 %v2693_v3, %v1012_v32  ;;  %2359 = vmatprep.mubr.msk.f32.mxu0 %vm344_vm1, %v330_v16  ;;  %v985_v42 = vmax.f32 %v328_v62, %v953_v29  ;;  %v3125_v31 = vld [vmem:[%s3769_s2] ss:$0 sm:$0xff] }
  0x44   : > { %v777_v44 = vsel %vm735_vm2, %v775_v20, %v776_v36  ;;  %v829_v45 = vsel %vm735_vm2, %v776_v36, -inf  ;;  %v874_v46 = vsel %vm832_vm3, %v872_v28, %v873_v37  ;;  %v875_v47 = vrot.slane %v332_v34, 7 }
  0x45   : > { %2400 = vmatprep.mubr.msk.f32.mxu1 %vm344_vm1, %v1041_v40  ;;  %v955_v48 = vmax.f32 %v777_v44, %v926_v35  ;;  %v956_v49 = vmax.f32 %v829_v45, %v874_v46  ;;  %v1013_v50 = vmax.f32 %v985_v42, %v2698_v6  ;;  %v1014_v51 = vmax.f32 %v986_v39, %v2693_v3 }
  0x46   : > { %2401 = vmatmul.mubr.msk.f32.gmra.mrb[20].mxu1 %vm344_vm1, %v1042_v41  ;;  %2360 = vmatmul.mubr.msk.f32.gmra.mrb[26].mxu0 %vm344_vm1, %v331_v33  ;;  %v927_v53 = vsel %vm832_vm3, -inf, %v875_v47  ;;  %v779_v54 = vrot.slane %v333_v52, 1  ;;  %v876_v55 = vrot.slane %v333_v52, 7  ;;  %v781_v56 = vrot.slane %v334_v43, 1 }
  0x47   : > { %v988_v57 = vmax.f32 %v331_v33, %v956_v49  ;;  %v1043_v58 = vmax.f32 %v983_v24, %v1013_v50  ;;  %v1044_v59 = vmax.f32 %v2713_v21, %v1014_v51  ;;  %2362 = vmatprep.mubr.msk.f32.mxu0 %vm344_vm1, %v332_v34  ;;  %v987_v60 = vmax.f32 %v330_v16, %v955_v48  ;;  %v3155_v49 = vld [vmem:[%s3771_s4] ss:$0 sm:$0xff] }
  0x48   : > { %v780_v62 = vsel %vm735_vm2, %v778_v38, %v779_v54  ;;  %v830_v63 = vsel %vm735_vm2, %v779_v54, -inf  ;;  %v877_v0 = vsel %vm832_vm3, %v875_v47, %v876_v55  ;;  %v878_v1 = vrot.slane %v334_v43, 7 }
  0x49   : > { %2403 = vmatprep.mubr.msk.f32.mxu1 %vm344_vm1, %v1043_v58  ;;  %v957_v2 = vmax.f32 %v780_v62, %v927_v53  ;;  %v958_v3 = vmax.f32 %v830_v63, %v877_v0  ;;  %v1015_v4 = vmax.f32 %v987_v60, %v983_v24  ;;  %v1016_v5 = vmax.f32 %v988_v57, %v2713_v21 }
  0x4a   : > { %2404 = vmatmul.mubr.msk.f32.gmra.mrb[22].mxu1 %vm344_vm1, %v1044_v59  ;;  %2363 = vmatmul.mubr.msk.f32.gmra.mrb[28].mxu0 %vm344_vm1, %v333_v52  ;;  %v928_v6 = vsel %vm832_vm3, -inf, %v878_v1  ;;  %v782_v7 = vrot.slane %v335_v61, 1  ;;  %v879_v8 = vrot.slane %v335_v61, 7  ;;  %v2440_v30 = vmov 0.0  }
  0x4b   : > { %v990_v9 = vmax.f32 %v333_v52, %v958_v3  ;;  %v1045_v10 = vmax.f32 %v985_v42, %v1015_v4  ;;  %v1046_v11 = vmax.f32 %v986_v39, %v1016_v5  ;;  %2365 = vmatprep.mubr.msk.f32.mxu0 %vm344_vm1, %v334_v43  ;;  %v989_v12 = vmax.f32 %v332_v34, %v957_v2 }
  0x4c   : > { %v783_v13 = vsel %vm735_vm2, %v781_v56, %v782_v7  ;;  %v831_v14 = vsel %vm735_vm2, %v782_v7, -inf  ;;  %v880_v15 = vsel %vm832_vm3, %v878_v1, %v879_v8  ;;  %1581 = vst.msk [vmem:[%s2773_s15 + $0x10] sm:$0x3] %vm1580_vm4, %v2440_v30  ;;  %1584 = vst.msk [vmem:[%s2773_s15 + $0x28] sm:$0x3] %vm1580_vm4, %v2440_v30 }
  0x4d   : > { %2406 = vmatprep.mubr.msk.f32.mxu1 %vm344_vm1, %v1045_v10  ;;  %v959_v16 = vmax.f32 %v783_v13, %v928_v6  ;;  %v960_v17 = vmax.f32 %v831_v14, %v880_v15  ;;  %v1017_v18 = vmax.f32 %v989_v12, %v985_v42  ;;  %v1018_v19 = vmax.f32 %v990_v9, %v986_v39 }
  0x4e   : > { %2407 = vmatmul.mubr.msk.f32.gmra.mrb[24].mxu1 %vm344_vm1, %v1046_v11  ;;  %2366 = vmatmul.mubr.msk.f32.gmra.mrb[30].mxu0 %vm344_vm1, %v335_v61  ;;  %1583 = vst.msk [vmem:[%s2773_s15 + $0x20] sm:$0xff] %vm344_vm1, %v2440_v30  ;;  %1578 = vst.msk [vmem:[%s2773_s15] sm:$0xff] %vm344_vm1, %v2440_v30 }
  0x4f   : > { %v992_v20 = vmax.f32 %v335_v61, %v960_v17  ;;  %v1047_v21 = vmax.f32 %v987_v60, %v1017_v18  ;;  %v1048_v22 = vmax.f32 %v988_v57, %v1018_v19  ;;  %v991_v23 = vmax.f32 %v334_v43, %v959_v16  ;;  %1632 = vst.msk [vmem:[%s2773_s15 + $0x1a8] sm:$0x3] %vm1580_vm4, %v2440_v30 }
  0x50   : > { %1579 = vst.msk [vmem:[%s2773_s15 + $0x8] sm:$0xff] %vm344_vm1, %v2440_v30  ;;  %1582 = vst.msk [vmem:[%s2773_s15 + $0x18] sm:$0xff] %vm344_vm1, %v2440_v30 }
  0x51   : > { %2409 = vmatprep.mubr.msk.f32.mxu1 %vm344_vm1, %v1047_v21  ;;  %v1019_v24 = vmax.f32 %v991_v23, %v987_v60  ;;  %v1020_v25 = vmax.f32 %v992_v20, %v988_v57  ;;  %v1051_v28 = vmax.f32 %v991_v23, %v989_v12  ;;  %v1052_v29 = vmax.f32 %v992_v20, %v990_v9 }
  0x52   : > { %2410 = vmatmul.mubr.msk.f32.gmra.mrb[26].mxu1 %vm344_vm1, %v1048_v22  ;;  %1585 = vst.msk [vmem:[%s2773_s15 + $0x30] sm:$0xff] %vm344_vm1, %v2440_v30  ;;  %1586 = vst.msk [vmem:[%s2773_s15 + $0x38] sm:$0xff] %vm344_vm1, %v2440_v30 }
  0x53   : > { %v1049_v26 = vmax.f32 %v989_v12, %v1019_v24  ;;  %v1050_v27 = vmax.f32 %v990_v9, %v1020_v25  ;;  %1587 = vst.msk [vmem:[%s2773_s15 + $0x40] sm:$0x3] %vm1580_vm4, %v2440_v30  ;;  %1590 = vst.msk [vmem:[%s2773_s15 + $0x58] sm:$0x3] %vm1580_vm4, %v2440_v30 }
  0x54   : > { %1588 = vst.msk [vmem:[%s2773_s15 + $0x48] sm:$0xff] %vm344_vm1, %v2440_v30  ;;  %1589 = vst.msk [vmem:[%s2773_s15 + $0x50] sm:$0xff] %vm344_vm1, %v2440_v30 }
  0x55   : > { %2412 = vmatprep.mubr.msk.f32.mxu1 %vm344_vm1, %v1049_v26  ;;  %1591 = vst.msk [vmem:[%s2773_s15 + $0x60] sm:$0xff] %vm344_vm1, %v2440_v30  ;;  %1592 = vst.msk [vmem:[%s2773_s15 + $0x68] sm:$0xff] %vm344_vm1, %v2440_v30 }
  0x56   : > { %2413 = vmatmul.mubr.msk.f32.gmra.mrb[28].mxu1 %vm344_vm1, %v1050_v27  ;;  %1593 = vst.msk [vmem:[%s2773_s15 + $0x70] sm:$0x3] %vm1580_vm4, %v2440_v30  ;;  %1596 = vst.msk [vmem:[%s2773_s15 + $0x88] sm:$0x3] %vm1580_vm4, %v2440_v30 }
  0x57   : > { %2415 = vmatprep.mubr.msk.f32.mxu1 %vm344_vm1, %v1051_v28  ;;  %1594 = vst.msk [vmem:[%s2773_s15 + $0x78] sm:$0xff] %vm344_vm1, %v2440_v30  ;;  %1595 = vst.msk [vmem:[%s2773_s15 + $0x80] sm:$0xff] %vm344_vm1, %v2440_v30 }
  0x58   : > { %1597 = vst.msk [vmem:[%s2773_s15 + $0x90] sm:$0xff] %vm344_vm1, %v2440_v30  ;;  %1598 = vst.msk [vmem:[%s2773_s15 + $0x98] sm:$0xff] %vm344_vm1, %v2440_v30 }
  0x59   : > { %1599 = vst.msk [vmem:[%s2773_s15 + $0xa0] sm:$0x3] %vm1580_vm4, %v2440_v30  ;;  %1602 = vst.msk [vmem:[%s2773_s15 + $0xb8] sm:$0x3] %vm1580_vm4, %v2440_v30 }
  0x5a   : > { %2416 = vmatmul.mubr.msk.f32.gmra.mrb[30].mxu1 %vm344_vm1, %v1052_v29  ;;  %1600 = vst.msk [vmem:[%s2773_s15 + $0xa8] sm:$0xff] %vm344_vm1, %v2440_v30  ;;  %1601 = vst.msk [vmem:[%s2773_s15 + $0xb0] sm:$0xff] %vm344_vm1, %v2440_v30 }
  0x5b   : > { %1603 = vst.msk [vmem:[%s2773_s15 + $0xc0] sm:$0xff] %vm344_vm1, %v2440_v30  ;;  %1604 = vst.msk [vmem:[%s2773_s15 + $0xc8] sm:$0xff] %vm344_vm1, %v2440_v30 }
  0x5c   : > { %1605 = vst.msk [vmem:[%s2773_s15 + $0xd0] sm:$0x3] %vm1580_vm4, %v2440_v30  ;;  %1608 = vst.msk [vmem:[%s2773_s15 + $0xe8] sm:$0x3] %vm1580_vm4, %v2440_v30 }
  0x5d   : > { %1606 = vst.msk [vmem:[%s2773_s15 + $0xd8] sm:$0xff] %vm344_vm1, %v2440_v30  ;;  %1607 = vst.msk [vmem:[%s2773_s15 + $0xe0] sm:$0xff] %vm344_vm1, %v2440_v30 }
  0x5e   : > { %1609 = vst.msk [vmem:[%s2773_s15 + $0xf0] sm:$0xff] %vm344_vm1, %v2440_v30  ;;  %1610 = vst.msk [vmem:[%s2773_s15 + $0xf8] sm:$0xff] %vm344_vm1, %v2440_v30 }
  0x5f   : > { %1611 = vst.msk [vmem:[%s2773_s15 + $0x100] sm:$0x3] %vm1580_vm4, %v2440_v30  ;;  %1614 = vst.msk [vmem:[%s2773_s15 + $0x118] sm:$0x3] %vm1580_vm4, %v2440_v30 }
  0x60   : > { %1612 = vst.msk [vmem:[%s2773_s15 + $0x108] sm:$0xff] %vm344_vm1, %v2440_v30  ;;  %1613 = vst.msk [vmem:[%s2773_s15 + $0x110] sm:$0xff] %vm344_vm1, %v2440_v30 }
  0x61   : > { %1615 = vst.msk [vmem:[%s2773_s15 + $0x120] sm:$0xff] %vm344_vm1, %v2440_v30  ;;  %1616 = vst.msk [vmem:[%s2773_s15 + $0x128] sm:$0xff] %vm344_vm1, %v2440_v30 }
  0x62   : > { %1617 = vst.msk [vmem:[%s2773_s15 + $0x130] sm:$0x3] %vm1580_vm4, %v2440_v30  ;;  %1620 = vst.msk [vmem:[%s2773_s15 + $0x148] sm:$0x3] %vm1580_vm4, %v2440_v30 }
  0x63   : > { %1618 = vst.msk [vmem:[%s2773_s15 + $0x138] sm:$0xff] %vm344_vm1, %v2440_v30  ;;  %1619 = vst.msk [vmem:[%s2773_s15 + $0x140] sm:$0xff] %vm344_vm1, %v2440_v30 }
  0x64   : > { %1621 = vst.msk [vmem:[%s2773_s15 + $0x150] sm:$0xff] %vm344_vm1, %v2440_v30  ;;  %1622 = vst.msk [vmem:[%s2773_s15 + $0x158] sm:$0xff] %vm344_vm1, %v2440_v30 }
  0x65   : > { %1623 = vst.msk [vmem:[%s2773_s15 + $0x160] sm:$0x3] %vm1580_vm4, %v2440_v30  ;;  %1626 = vst.msk [vmem:[%s2773_s15 + $0x178] sm:$0x3] %vm1580_vm4, %v2440_v30 }
  0x66   : > { %1624 = vst.msk [vmem:[%s2773_s15 + $0x168] sm:$0xff] %vm344_vm1, %v2440_v30  ;;  %1625 = vst.msk [vmem:[%s2773_s15 + $0x170] sm:$0xff] %vm344_vm1, %v2440_v30 }
  0x67   : > { %1627 = vst.msk [vmem:[%s2773_s15 + $0x180] sm:$0xff] %vm344_vm1, %v2440_v30  ;;  %1628 = vst.msk [vmem:[%s2773_s15 + $0x188] sm:$0xff] %vm344_vm1, %v2440_v30 }
  0x68   : > { %1629 = vst.msk [vmem:[%s2773_s15 + $0x190] sm:$0x3] %vm1580_vm4, %v2440_v30 }
  0x69   : > { %1630 = vst.msk [vmem:[%s2773_s15 + $0x198] sm:$0xff] %vm344_vm1, %v2440_v30  ;;  %1631 = vst.msk [vmem:[%s2773_s15 + $0x1a0] sm:$0xff] %vm344_vm1, %v2440_v30 }
  0x6a   : > { %1794 = vst.msk [vmem:[%s2778_s18] sm:$0xff] %vm344_vm1, %v2440_v30  ;;  %1795 = vst.msk [vmem:[%s2778_s18 + $0x8] sm:$0xff] %vm344_vm1, %v2440_v30 }
  0x6b   : > { %1798 = vst.msk [vmem:[%s2778_s18 + $0x18] sm:$0xff] %vm344_vm1, %v2440_v30  ;;  %1799 = vst.msk [vmem:[%s2778_s18 + $0x20] sm:$0xff] %vm344_vm1, %v2440_v30 }
  0x6c   : > { %1801 = vst.msk [vmem:[%s2778_s18 + $0x30] sm:$0xff] %vm344_vm1, %v2440_v30  ;;  %1802 = vst.msk [vmem:[%s2778_s18 + $0x38] sm:$0xff] %vm344_vm1, %v2440_v30 }
  0x6d   : > { %1804 = vst.msk [vmem:[%s2778_s18 + $0x48] sm:$0xff] %vm344_vm1, %v2440_v30  ;;  %1805 = vst.msk [vmem:[%s2778_s18 + $0x50] sm:$0xff] %vm344_vm1, %v2440_v30 }
  0x6e   : > { %1807 = vst.msk [vmem:[%s2778_s18 + $0x60] sm:$0xff] %vm344_vm1, %v2440_v30  ;;  %1808 = vst.msk [vmem:[%s2778_s18 + $0x68] sm:$0xff] %vm344_vm1, %v2440_v30 }
  0x6f   : > { %1810 = vst.msk [vmem:[%s2778_s18 + $0x78] sm:$0xff] %vm344_vm1, %v2440_v30  ;;  %1811 = vst.msk [vmem:[%s2778_s18 + $0x80] sm:$0xff] %vm344_vm1, %v2440_v30 }
  0x70   : > { %1813 = vst.msk [vmem:[%s2778_s18 + $0x90] sm:$0xff] %vm344_vm1, %v2440_v30  ;;  %1814 = vst.msk [vmem:[%s2778_s18 + $0x98] sm:$0xff] %vm344_vm1, %v2440_v30 }
  0x71   : > { %1816 = vst.msk [vmem:[%s2778_s18 + $0xa8] sm:$0xff] %vm344_vm1, %v2440_v30  ;;  %1817 = vst.msk [vmem:[%s2778_s18 + $0xb0] sm:$0xff] %vm344_vm1, %v2440_v30 }
  0x72   : > { %1819 = vst.msk [vmem:[%s2778_s18 + $0xc0] sm:$0xff] %vm344_vm1, %v2440_v30  ;;  %1820 = vst.msk [vmem:[%s2778_s18 + $0xc8] sm:$0xff] %vm344_vm1, %v2440_v30 }
  0x73   : > { %1822 = vst.msk [vmem:[%s2778_s18 + $0xd8] sm:$0xff] %vm344_vm1, %v2440_v30  ;;  %1823 = vst.msk [vmem:[%s2778_s18 + $0xe0] sm:$0xff] %vm344_vm1, %v2440_v30 }
  0x74   : > { %1825 = vst.msk [vmem:[%s2778_s18 + $0xf0] sm:$0xff] %vm344_vm1, %v2440_v30  ;;  %1826 = vst.msk [vmem:[%s2778_s18 + $0xf8] sm:$0xff] %vm344_vm1, %v2440_v30 }
  0x75   : > { %1828 = vst.msk [vmem:[%s2778_s18 + $0x108] sm:$0xff] %vm344_vm1, %v2440_v30  ;;  %1829 = vst.msk [vmem:[%s2778_s18 + $0x110] sm:$0xff] %vm344_vm1, %v2440_v30 }
  0x76   : > { %1831 = vst.msk [vmem:[%s2778_s18 + $0x120] sm:$0xff] %vm344_vm1, %v2440_v30  ;;  %1832 = vst.msk [vmem:[%s2778_s18 + $0x128] sm:$0xff] %vm344_vm1, %v2440_v30 }
  0x77   : > { %1834 = vst.msk [vmem:[%s2778_s18 + $0x138] sm:$0xff] %vm344_vm1, %v2440_v30  ;;  %1835 = vst.msk [vmem:[%s2778_s18 + $0x140] sm:$0xff] %vm344_vm1, %v2440_v30 }
  0x78   : > { %1837 = vst.msk [vmem:[%s2778_s18 + $0x150] sm:$0xff] %vm344_vm1, %v2440_v30  ;;  %1838 = vst.msk [vmem:[%s2778_s18 + $0x158] sm:$0xff] %vm344_vm1, %v2440_v30 }
  0x79   : > { %1840 = vst.msk [vmem:[%s2778_s18 + $0x168] sm:$0xff] %vm344_vm1, %v2440_v30  ;;  %1841 = vst.msk [vmem:[%s2778_s18 + $0x170] sm:$0xff] %vm344_vm1, %v2440_v30 }
  0x7a   : > { %1843 = vst.msk [vmem:[%s2778_s18 + $0x180] sm:$0xff] %vm344_vm1, %v2440_v30  ;;  %1844 = vst.msk [vmem:[%s2778_s18 + $0x188] sm:$0xff] %vm344_vm1, %v2440_v30 }
  0x7b   : > { %1846 = vst.msk [vmem:[%s2778_s18 + $0x198] sm:$0xff] %vm344_vm1, %v2440_v30  ;;  %1847 = vst.msk [vmem:[%s2778_s18 + $0x1a0] sm:$0xff] %vm344_vm1, %v2440_v30 }
  0x7c   : > { %1849 = vst.msk [vmem:[%s2778_s18 + $0x1b0] sm:$0xff] %vm344_vm1, %v2440_v30  ;;  %1850 = vst.msk [vmem:[%s2778_s18 + $0x1b8] sm:$0xff] %vm344_vm1, %v2440_v30 }
  0x7d   : > { %1852 = vst.msk [vmem:[%s2778_s18 + $0x1c8] sm:$0xff] %vm344_vm1, %v2440_v30  ;;  %1853 = vst.msk [vmem:[%s2778_s18 + $0x1d0] sm:$0xff] %vm344_vm1, %v2440_v30 }
  0x7e   : > { %1797 = vst.msk [vmem:[%s2778_s18 + $0x10] sm:$0xf] %vm1796_vm5, %v2440_v30  ;;  %1800 = vst.msk [vmem:[%s2778_s18 + $0x28] sm:$0xf] %vm1796_vm5, %v2440_v30 }
  0x7f   : > { %1803 = vst.msk [vmem:[%s2778_s18 + $0x40] sm:$0xf] %vm1796_vm5, %v2440_v30  ;;  %1851 = vst.msk [vmem:[%s2778_s18 + $0x1c0] sm:$0xf] %vm1796_vm5, %v2440_v30 }
  0x80   : > { %1854 = vst.msk [vmem:[%s2778_s18 + $0x1d8] sm:$0xf] %vm1796_vm5, %v2440_v30  ;;  %1806 = vst.msk [vmem:[%s2778_s18 + $0x58] sm:$0xf] %vm1796_vm5, %v2440_v30 }
  0x81   : > { %1809 = vst.msk [vmem:[%s2778_s18 + $0x70] sm:$0xf] %vm1796_vm5, %v2440_v30  ;;  %1812 = vst.msk [vmem:[%s2778_s18 + $0x88] sm:$0xf] %vm1796_vm5, %v2440_v30 }
  0x82   : > { %1815 = vst.msk [vmem:[%s2778_s18 + $0xa0] sm:$0xf] %vm1796_vm5, %v2440_v30  ;;  %1818 = vst.msk [vmem:[%s2778_s18 + $0xb8] sm:$0xf] %vm1796_vm5, %v2440_v30 }
  0x83   : > { %1821 = vst.msk [vmem:[%s2778_s18 + $0xd0] sm:$0xf] %vm1796_vm5, %v2440_v30  ;;  %1824 = vst.msk [vmem:[%s2778_s18 + $0xe8] sm:$0xf] %vm1796_vm5, %v2440_v30 }
  0x84   : > { %1827 = vst.msk [vmem:[%s2778_s18 + $0x100] sm:$0xf] %vm1796_vm5, %v2440_v30  ;;  %1830 = vst.msk [vmem:[%s2778_s18 + $0x118] sm:$0xf] %vm1796_vm5, %v2440_v30 }
  0x85   : > { %1833 = vst.msk [vmem:[%s2778_s18 + $0x130] sm:$0xf] %vm1796_vm5, %v2440_v30  ;;  %1836 = vst.msk [vmem:[%s2778_s18 + $0x148] sm:$0xf] %vm1796_vm5, %v2440_v30 }
  0x86   : > { %1839 = vst.msk [vmem:[%s2778_s18 + $0x160] sm:$0xf] %vm1796_vm5, %v2440_v30  ;;  %1842 = vst.msk [vmem:[%s2778_s18 + $0x178] sm:$0xf] %vm1796_vm5, %v2440_v30 }
  0x87   : > { %1845 = vst.msk [vmem:[%s2778_s18 + $0x190] sm:$0xf] %vm1796_vm5, %v2440_v30  ;;  %1848 = vst.msk [vmem:[%s2778_s18 + $0x1a8] sm:$0xf] %vm1796_vm5, %v2440_v30 }
  0xe5   : > { %v2322_v32 = vpop.f32.mrb[0].mxu0 }
  0xe6   : > { %v517_v33 = vadd.f32 %v2322_v32, %v3125_v31  ;;  %v511_v34 = vpop.f32.mrb[1].mxu0 }
  0xe7   : > { %v512_v35 = vadd.f32 %v3125_v31, %v511_v34 }
  0xe8   : > { %v671_v36 = vmax.f32 %v517_v33, 0.0 }
  0xe9   : > { %v670_v37 = vmax.f32 %v512_v35, 0.0  ;;  %v2325_v38 = vpop.f32.mrb[2].mxu0 }
  0xea   : > { %704 = vst.msk [vmem:[%s3133_s23 + $0x8] sm:$0xff] %vm702_vm6, %v671_v36  ;;  %1667 = vrot.lane.b32.xlu1 %v671_v36, %s2441_s26  ;;  %v527_v39 = vadd.f32 %v2325_v38, %v3125_v31  ;;  %v521_v40 = vpop.f32.mrb[3].mxu0 }
  0xeb   : > { %703 = vst.msk [vmem:[%s3133_s23] sm:$0xff] %vm702_vm6, %v670_v37  ;;  %1665 = vrot.lane.b32.xlu0 %v670_v37, %s2441_s26  ;;  %v522_v41 = vadd.f32 %v3125_v31, %v521_v40 }
  0xec   : > { %v673_v42 = vmax.f32 %v527_v39, 0.0 }
  0xed   : > { %v672_v43 = vmax.f32 %v522_v41, 0.0  ;;  %v2328_v44 = vpop.f32.mrb[4].mxu0 }
  0xee   : > { %706 = vst.msk [vmem:[%s3133_s23 + $0x18] sm:$0xff] %vm702_vm6, %v673_v42  ;;  %1857 = vrot.lane.b32.xlu1 %v671_v36, %s2442_s25  ;;  %v537_v45 = vadd.f32 %v2328_v44, %v3125_v31  ;;  %v531_v46 = vpop.f32.mrb[5].mxu0 }
  0xef   : > { %705 = vst.msk [vmem:[%s3133_s23 + $0x10] sm:$0xff] %vm702_vm6, %v672_v43  ;;  %1855 = vrot.lane.b32.xlu0 %v670_v37, %s2442_s25  ;;  %v532_v47 = vadd.f32 %v3125_v31, %v531_v46 }
  0xf0   : > { %v675_v48 = vmax.f32 %v537_v45, 0.0 }
  0xf1   : > { %v2372_v50 = vpop.f32.mrb[0].mxu1  ;;  %v674_v51 = vmax.f32 %v532_v47, 0.0  ;;  %v2331_v52 = vpop.f32.mrb[6].mxu0 }
  0xf2   : > { %1671 = vrot.lane.b32.xlu1 %v673_v42, %s2441_s26  ;;  %708 = vst.msk [vmem:[%s3133_s23 + $0x28] sm:$0xff] %vm702_vm6, %v675_v48  ;;  %v1226_v53 = vpop.f32.mrb[1].mxu1  ;;  %v547_v54 = vadd.f32 %v2331_v52, %v3125_v31  ;;  %v541_v55 = vpop.f32.mrb[7].mxu0  ;;  %v1232_v56 = vadd.f32 %v2372_v50, %v3155_v49 }
  0xf3   : > { %1669 = vrot.lane.b32.xlu0 %v672_v43, %s2441_s26  ;;  %707 = vst.msk [vmem:[%s3133_s23 + $0x20] sm:$0xff] %vm702_vm6, %v674_v51  ;;  %v542_v57 = vadd.f32 %v3125_v31, %v541_v55  ;;  %v1227_v20 = vadd.f32 %v3155_v49, %v1226_v53 }
  0xf4   : > { %v677_v58 = vmax.f32 %v547_v54, 0.0  ;;  %v1386_v1 = vmax.f32 %v1232_v56, 0.0 }
  0xf5   : > { %v3166_v59 = vmax.f32 %v542_v57, 0.0  ;;  %v2375_v60 = vpop.f32.mrb[2].mxu1  ;;  %v2334_v61 = vpop.f32.mrb[8].mxu0  ;;  %v1385_v30 = vmax.f32 %v1227_v20, 0.0 }
  0xf6   : > { %1861 = vrot.lane.b32.xlu1 %v673_v42, %s2442_s25  ;;  %710 = vst.msk [vmem:[%s3133_s23 + $0x38] sm:$0xff] %vm702_vm6, %v677_v58  ;;  %v1236_v62 = vpop.f32.mrb[3].mxu1  ;;  %v557_v63 = vadd.f32 %v2334_v61, %v3125_v31  ;;  %v551_v0 = vpop.f32.mrb[9].mxu0  ;;  %v1242_v24 = vadd.f32 %v2375_v60, %v3155_v49 }
  0xf7   : > { %1859 = vrot.lane.b32.xlu0 %v672_v43, %s2442_s25  ;;  %709 = vst.msk [vmem:[%s3133_s23 + $0x30] sm:$0xff] %vm702_vm6, %v3166_v59  ;;  %v552_v2 = vadd.f32 %v3125_v31, %v551_v0  ;;  %v1237_v42 = vadd.f32 %v3155_v49, %v1236_v62 }
  0xf8   : > { %v3177_v3 = vmax.f32 %v557_v63, 0.0  ;;  %v1388_v35 = vmax.f32 %v1242_v24, 0.0 }
  0xf9   : > { %v3179_v4 = vmax.f32 %v552_v2, 0.0  ;;  %v3181_v5 = vpop.f32.mrb[4].mxu1  ;;  %v2337_v6 = vpop.f32.mrb[10].mxu0  ;;  %v1387_v54 = vmax.f32 %v1237_v42, 0.0 }
  0xfa   : > { %1675 = vrot.lane.b32.xlu1 %v675_v48, %s2441_s26  ;;  %712 = vst.msk [vmem:[%s3133_s23 + $0x48] sm:$0xff] %vm702_vm6, %v3177_v3  ;;  %v3187_v7 = vpop.f32.mrb[5].mxu1  ;;  %v567_v8 = vadd.f32 %v2337_v6, %v3125_v31  ;;  %v561_v9 = vpop.f32.mrb[11].mxu0 }
  0xfb   : > { %1451 = vrot.lane.b32.xlu0 %v1386_v1, %s2443_s29  ;;  %711 = vst.msk [vmem:[%s3133_s23 + $0x40] sm:$0xff] %vm702_vm6, %v3179_v4  ;;  %v562_v10 = vadd.f32 %v3125_v31, %v561_v9 }
  0xfc   : > { %v3195_v11 = vmax.f32 %v567_v8, 0.0 }
  0xfd   : > { %v3197_v12 = vmax.f32 %v562_v10, 0.0  ;;  %v3199_v13 = vpop.f32.mrb[6].mxu1  ;;  %v2340_v14 = vpop.f32.mrb[12].mxu0 }
  0xfe   : > { %1865 = vrot.lane.b32.xlu1 %v675_v48, %s2442_s25  ;;  %714 = vst.msk [vmem:[%s3133_s23 + $0x58] sm:$0xff] %vm702_vm6, %v3195_v11  ;;  %v3205_v15 = vpop.f32.mrb[7].mxu1  ;;  %v577_v16 = vadd.f32 %v2340_v14, %v3125_v31  ;;  %v571_v17 = vpop.f32.mrb[13].mxu0 }
  0xff   : > { %1673 = vrot.lane.b32.xlu0 %v674_v51, %s2441_s26  ;;  %713 = vst.msk [vmem:[%s3133_s23 + $0x50] sm:$0xff] %vm702_vm6, %v3197_v12  ;;  %v572_v18 = vadd.f32 %v3125_v31, %v571_v17 }
 0x100   : > { %v3213_v19 = vmax.f32 %v577_v16, 0.0 }
 0x101   : > { %v3216_v21 = vmax.f32 %v572_v18, 0.0  ;;  %v3218_v22 = vpop.f32.mrb[8].mxu1  ;;  %v2343_v23 = vpop.f32.mrb[14].mxu0  ;;  %v1247_v18 = vadd.f32 %v3155_v49, %v3187_v7 }
 0x102   : > { %1679 = vrot.lane.b32.xlu1 %v677_v58, %s2441_s26  ;;  %716 = vst.msk [vmem:[%s3133_s23 + $0x68] sm:$0xff] %vm702_vm6, %v3213_v19  ;;  %v3225_v25 = vpop.f32.mrb[9].mxu1  ;;  %v587_v26 = vadd.f32 %v2343_v23, %v3125_v31  ;;  %v581_v27 = vpop.f32.mrb[15].mxu0 }
 0x103   : > { %1863 = vrot.lane.b32.xlu0 %v674_v51, %s2442_s25  ;;  %715 = vst.msk [vmem:[%s3133_s23 + $0x60] sm:$0xff] %vm702_vm6, %v3216_v21  ;;  %v582_v28 = vadd.f32 %v3125_v31, %v581_v27 }
 0x104   : > { %v3233_v29 = vmax.f32 %v587_v26, 0.0 }
 0x105   : > { %v3235_v32 = vmax.f32 %v582_v28, 0.0  ;;  %v2387_v33 = vpop.f32.mrb[10].mxu1  ;;  %v2346_v34 = vpop.f32.mrb[16].mxu0 }
 0x106   : > { %1869 = vrot.lane.b32.xlu1 %v677_v58, %s2442_s25  ;;  %718 = vst.msk [vmem:[%s3133_s23 + $0x78] sm:$0xff] %vm702_vm6, %v3233_v29  ;;  %v3242_v36 = vadd.f32 %v2387_v33, %v3155_v49  ;;  %v1276_v37 = vpop.f32.mrb[11].mxu1  ;;  %v597_v38 = vadd.f32 %v2346_v34, %v3125_v31  ;;  %v591_v39 = vpop.f32.mrb[17].mxu0 }
 0x107   : > { %1449 = vrot.lane.b32.xlu0 %v1385_v30, %s2443_s29  ;;  %717 = vst.msk [vmem:[%s3133_s23 + $0x70] sm:$0xff] %vm702_vm6, %v3235_v32  ;;  %v3250_v40 = vadd.f32 %v3155_v49, %v1276_v37  ;;  %v592_v41 = vadd.f32 %v3125_v31, %v591_v39 }
 0x108   : > { %v3254_v43 = vmax.f32 %v597_v38, 0.0 }
 0x109   : > { %v3256_v44 = vmax.f32 %v592_v41, 0.0  ;;  %v2390_v45 = vpop.f32.mrb[12].mxu1  ;;  %v2349_v46 = vpop.f32.mrb[18].mxu0 }
 0x10a   : > { %1455 = vrot.lane.b32.xlu1 %v1388_v35, %s2443_s29  ;;  %720 = vst.msk [vmem:[%s3133_s23 + $0x88] sm:$0xff] %vm702_vm6, %v3254_v43  ;;  %v3263_v47 = vadd.f32 %v2390_v45, %v3155_v49  ;;  %v1286_v48 = vpop.f32.mrb[13].mxu1  ;;  %v607_v50 = vadd.f32 %v2349_v46, %v3125_v31  ;;  %v601_v51 = vpop.f32.mrb[19].mxu0  ;;  %v1389_v35 = vmax.f32 %v1247_v18, 0.0 }
 0x10b   : > { %1677 = vrot.lane.b32.xlu0 %v3166_v59, %s2441_s26  ;;  %719 = vst.msk [vmem:[%s3133_s23 + $0x80] sm:$0xff] %vm702_vm6, %v3256_v44  ;;  %v3272_v52 = vadd.f32 %v3155_v49, %v1286_v48  ;;  %v602_v53 = vadd.f32 %v3125_v31, %v601_v51 }
 0x10c   : > { %v3275_v55 = vmax.f32 %v607_v50, 0.0 }
 0x10d   : > { %v3277_v56 = vmax.f32 %v602_v53, 0.0  ;;  %v2393_v57 = vpop.f32.mrb[14].mxu1  ;;  %v2352_v58 = vpop.f32.mrb[20].mxu0 }
 0x10e   : > { %1453 = vrot.lane.b32.xlu1 %v1387_v54, %s2443_s29  ;;  %722 = vst.msk [vmem:[%s3133_s23 + $0x98] sm:$0xff] %vm702_vm6, %v3275_v55  ;;  %v3284_v60 = vadd.f32 %v2393_v57, %v3155_v49  ;;  %v1296_v61 = vpop.f32.mrb[15].mxu1  ;;  %v617_v62 = vadd.f32 %v2352_v58, %v3125_v31  ;;  %v611_v63 = vpop.f32.mrb[21].mxu0 }
 0x10f   : > { %1867 = vrot.lane.b32.xlu0 %v3166_v59, %s2442_s25  ;;  %721 = vst.msk [vmem:[%s3133_s23 + $0x90] sm:$0xff] %vm702_vm6, %v3277_v56  ;;  %v3293_v0 = vadd.f32 %v3155_v49, %v1296_v61  ;;  %v612_v1 = vadd.f32 %v3125_v31, %v611_v63  ;;  %v1252_v59 = vadd.f32 %v3181_v5, %v3155_v49 }
 0x110   : > { %v3296_v2 = vmax.f32 %v617_v62, 0.0  ;;  %v1262_v61 = vadd.f32 %v3199_v13, %v3155_v49 }
 0x111   : > { %v3298_v6 = vmax.f32 %v612_v1, 0.0  ;;  %v2396_v8 = vpop.f32.mrb[16].mxu1  ;;  %v2355_v9 = vpop.f32.mrb[22].mxu0  ;;  %v1390_v28 = vmax.f32 %v1252_v59, 0.0 }
 0x112   : > { %1683 = vrot.lane.b32.xlu1 %v3177_v3, %s2441_s26  ;;  %724 = vst.msk [vmem:[%s3133_s23 + $0xa8] sm:$0xff] %vm702_vm6, %v3296_v2  ;;  %v3308_v10 = vadd.f32 %v2396_v8, %v3155_v49  ;;  %v1306_v14 = vpop.f32.mrb[17].mxu1  ;;  %v627_v16 = vadd.f32 %v2355_v9, %v3125_v31  ;;  %v621_v17 = vpop.f32.mrb[23].mxu0  ;;  %v1257_v9 = vadd.f32 %v3155_v49, %v3205_v15 }
 0x113   : > { %1681 = vrot.lane.b32.xlu0 %v3179_v4, %s2441_s26  ;;  %723 = vst.msk [vmem:[%s3133_s23 + $0xa0] sm:$0xff] %vm702_vm6, %v3298_v6  ;;  %v3319_v5 = vadd.f32 %v3155_v49, %v1306_v14  ;;  %v622_v20 = vadd.f32 %v3125_v31, %v621_v17 }
 0x114   : > { %v3322_v23 = vmax.f32 %v627_v16, 0.0 }
 0x115   : > { %v3324_v24 = vmax.f32 %v622_v20, 0.0  ;;  %v2399_v26 = vpop.f32.mrb[18].mxu1  ;;  %v2358_v27 = vpop.f32.mrb[24].mxu0  ;;  %v1392_v20 = vmax.f32 %v1262_v61, 0.0 }
 0x116   : > { %1873 = vrot.lane.b32.xlu1 %v3177_v3, %s2442_s25  ;;  %726 = vst.msk [vmem:[%s3133_s23 + $0xb8] sm:$0xff] %vm702_vm6, %v3322_v23  ;;  %v3332_v7 = vadd.f32 %v2399_v26, %v3155_v49  ;;  %v1316_v30 = vpop.f32.mrb[19].mxu1  ;;  %v637_v33 = vadd.f32 %v2358_v27, %v3125_v31  ;;  %v631_v34 = vpop.f32.mrb[25].mxu0 }
 0x117   : > { %1871 = vrot.lane.b32.xlu0 %v3179_v4, %s2442_s25  ;;  %725 = vst.msk [vmem:[%s3133_s23 + $0xb0] sm:$0xff] %vm702_vm6, %v3324_v24  ;;  %v3341_v3 = vadd.f32 %v3155_v49, %v1316_v30  ;;  %v632_v37 = vadd.f32 %v3125_v31, %v631_v34  ;;  %v1391_v30 = vmax.f32 %v1257_v9, 0.0 }
 0x118   : > { %v3344_v38 = vmax.f32 %v637_v33, 0.0 }
 0x119   : > { %v3346_v39 = vmax.f32 %v632_v37, 0.0  ;;  %v2402_v41 = vpop.f32.mrb[20].mxu1  ;;  %v2361_v42 = vpop.f32.mrb[26].mxu0 }
 0x11a   : > { %1459 = vrot.lane.b32.xlu1 %v1390_v28, %s2443_s29  ;;  %728 = vst.msk [vmem:[%s3133_s23 + $0xc8] sm:$0xff] %vm702_vm6, %v3344_v38  ;;  %v3353_v4 = vadd.f32 %v2402_v41, %v3155_v49  ;;  %v1326_v45 = vpop.f32.mrb[21].mxu1  ;;  %v647_v46 = vadd.f32 %v2361_v42, %v3125_v31  ;;  %v641_v48 = vpop.f32.mrb[27].mxu0 }
 0x11b   : > { %1457 = vrot.lane.b32.xlu0 %v1389_v35, %s2443_s29  ;;  %727 = vst.msk [vmem:[%s3133_s23 + $0xc0] sm:$0xff] %vm702_vm6, %v3346_v39  ;;  %v3361_v50 = vadd.f32 %v3155_v49, %v1326_v45  ;;  %v642_v51 = vadd.f32 %v3125_v31, %v641_v48  ;;  %v1272_v45 = vadd.f32 %v3218_v22, %v3155_v49 }
 0x11c   : > { %v3364_v53 = vmax.f32 %v647_v46, 0.0  ;;  %v1406_v9 = vmax.f32 %v3353_v4, 0.0 }
 0x11d   : > { %v3366_v54 = vmax.f32 %v642_v51, 0.0  ;;  %v2405_v57 = vpop.f32.mrb[22].mxu1  ;;  %v2364_v58 = vpop.f32.mrb[28].mxu0  ;;  %v1267_v51 = vadd.f32 %v3155_v49, %v3225_v25  ;;  %v1394_v61 = vmax.f32 %v1272_v45, 0.0  ;;  %v1397_v25 = vmax.f32 %v3272_v52, 0.0 }
 0x11e   : > { %1687 = vrot.lane.b32.xlu1 %v3195_v11, %s2441_s26  ;;  %730 = vst.msk [vmem:[%s3133_s23 + $0xd8] sm:$0xff] %vm702_vm6, %v3364_v53  ;;  %v3376_v62 = vadd.f32 %v2405_v57, %v3155_v49  ;;  %v1336_v63 = vpop.f32.mrb[23].mxu1  ;;  %v657_v1 = vadd.f32 %v2364_v58, %v3125_v31  ;;  %v651_v8 = vpop.f32.mrb[29].mxu0 }
 0x11f   : > { %1685 = vrot.lane.b32.xlu0 %v3197_v12, %s2441_s26  ;;  %729 = vst.msk [vmem:[%s3133_s23 + $0xd0] sm:$0xff] %vm702_vm6, %v3366_v54  ;;  %v3387_v13 = vadd.f32 %v3155_v49, %v1336_v63  ;;  %v652_v59 = vadd.f32 %v3125_v31, %v651_v8 }
 0x120   : > { %v3390_v14 = vmax.f32 %v657_v1, 0.0  ;;  %v1393_v1 = vmax.f32 %v1267_v51, 0.0 }
 0x121   : > { %v3392_v16 = vmax.f32 %v652_v59, 0.0  ;;  %v2408_v17 = vpop.f32.mrb[24].mxu1  ;;  %v2367_v18 = vpop.f32.mrb[30].mxu0  ;;  %v1405_v59 = vmax.f32 %v3361_v50, 0.0 }
 0x122   : > { %1877 = vrot.lane.b32.xlu1 %v3195_v11, %s2442_s25  ;;  %732 = vst.msk [vmem:[%s3133_s23 + $0xe8] sm:$0xff] %vm702_vm6, %v3390_v14  ;;  %v3400_v15 = vadd.f32 %v2408_v17, %v3155_v49  ;;  %v1346_v26 = vpop.f32.mrb[25].mxu1  ;;  %v667_v27 = vadd.f32 %v2367_v18, %v3125_v31  ;;  %v661_v28 = vpop.f32.mrb[31].mxu0 }
 0x123   : > { %1875 = vrot.lane.b32.xlu0 %v3197_v12, %s2442_s25  ;;  %731 = vst.msk [vmem:[%s3133_s23 + $0xe0] sm:$0xff] %vm702_vm6, %v3392_v16  ;;  %v3409_v11 = vadd.f32 %v3155_v49, %v1346_v26  ;;  %v662_v33 = vadd.f32 %v3125_v31, %v661_v28  ;;  %v1407_v26 = vmax.f32 %v3387_v13, 0.0 }
 0x124   : > { %v3412_v34 = vmax.f32 %v667_v27, 0.0 }
 0x125   : > { %v3414_v35 = vmax.f32 %v662_v33, 0.0  ;;  %v2411_v37 = vpop.f32.mrb[26].mxu1  ;;  %v1409_v33 = vmax.f32 %v3409_v11, 0.0 }
 0x126   : > { %1463 = vrot.lane.b32.xlu1 %v1392_v20, %s2443_s29  ;;  %734 = vst.msk [vmem:[%s3133_s23 + $0xf8] sm:$0xff] %vm702_vm6, %v3412_v34  ;;  %v3421_v12 = vadd.f32 %v2411_v37, %v3155_v49  ;;  %v1356_v41 = vpop.f32.mrb[27].mxu1  ;;  %v1408_v20 = vmax.f32 %v3376_v62, 0.0 }
 0x127   : > { %1461 = vrot.lane.b32.xlu0 %v1391_v30, %s2443_s29  ;;  %733 = vst.msk [vmem:[%s3133_s23 + $0xf0] sm:$0xff] %vm702_vm6, %v3414_v35  ;;  %v3428_v31 = vadd.f32 %v3155_v49, %v1356_v41  ;;  %v1410_v30 = vmax.f32 %v3400_v15, 0.0 }
 0x128   : > { %v1412_v11 = vmax.f32 %v3421_v12, 0.0 }
 0x129   : > { %v2414_v42 = vpop.f32.mrb[28].mxu1 }
 0x12a   : > { %1691 = vrot.lane.b32.xlu1 %v3213_v19, %s2441_s26  ;;  %v3435_v46 = vadd.f32 %v2414_v42, %v3155_v49  ;;  %v1366_v48 = vpop.f32.mrb[29].mxu1 }
 0x12b   : > { %1689 = vrot.lane.b32.xlu0 %v3216_v21, %s2441_s26  ;;  %v3442_v57 = vadd.f32 %v3155_v49, %v1366_v48 }
 0x12c   : > { %v1414_v48 = vmax.f32 %v3435_v46, 0.0 }
 0x12d   : > { %v2417_v58 = vpop.f32.mrb[30].mxu1  ;;  %v1413_v12 = vmax.f32 %v3442_v57, 0.0 }
 0x12e   : > { %1881 = vrot.lane.b32.xlu1 %v3213_v19, %s2442_s25  ;;  %v3447_v22 = vadd.f32 %v2417_v58, %v3155_v49  ;;  %v1376_v63 = vpop.f32.mrb[31].mxu1  ;;  %v1396_v19 = vmax.f32 %v3242_v36, 0.0 }
 0x12f   : > { %1879 = vrot.lane.b32.xlu0 %v3216_v21, %s2442_s25  ;;  %v3452_v8 = vadd.f32 %v3155_v49, %v1376_v63  ;;  %v1395_v21 = vmax.f32 %v3250_v40, 0.0  ;;  %v1398_v49 = vmax.f32 %v3263_v47, 0.0 }
 0x130   : > { %v1416_v58 = vmax.f32 %v3447_v22, 0.0 }
 0x131   : > { %v1415_v46 = vmax.f32 %v3452_v8, 0.0 }
 0x132   : > { %1467 = vrot.lane.b32.xlu1 %v1394_v61, %s2443_s29 }
 0x133   : > { %1465 = vrot.lane.b32.xlu0 %v1393_v1, %s2443_s29 }
 0x136   : > { %1695 = vrot.lane.b32.xlu1 %v3233_v29, %s2441_s26 }
 0x137   : > { %1693 = vrot.lane.b32.xlu0 %v3235_v32, %s2441_s26 }
 0x13a   : > { %1885 = vrot.lane.b32.xlu1 %v3233_v29, %s2442_s25  ;;  %v1400_v29 = vmax.f32 %v3284_v60, 0.0 }
 0x13b   : > { %1883 = vrot.lane.b32.xlu0 %v3235_v32, %s2442_s25  ;;  %v1399_v32 = vmax.f32 %v3293_v0, 0.0 }
 0x13e   : > { %1471 = vrot.lane.b32.xlu1 %v1396_v19, %s2443_s29 }
 0x13f   : > { %1469 = vrot.lane.b32.xlu0 %v1395_v21, %s2443_s29 }
 0x142   : > { %1699 = vrot.lane.b32.xlu1 %v3254_v43, %s2441_s26 }
 0x143   : > { %1697 = vrot.lane.b32.xlu0 %v3256_v44, %s2441_s26 }
 0x146   : > { %1889 = vrot.lane.b32.xlu1 %v3254_v43, %s2442_s25  ;;  %v1402_v43 = vmax.f32 %v3308_v10, 0.0 }
 0x147   : > { %1887 = vrot.lane.b32.xlu0 %v3256_v44, %s2442_s25  ;;  %v1401_v44 = vmax.f32 %v3319_v5, 0.0 }
 0x14a   : > { %1475 = vrot.lane.b32.xlu1 %v1398_v49, %s2443_s29 }
 0x14b   : > { %1473 = vrot.lane.b32.xlu0 %v1397_v25, %s2443_s29 }
 0x14e   : > { %1703 = vrot.lane.b32.xlu1 %v3275_v55, %s2441_s26 }
 0x14f   : > { %1701 = vrot.lane.b32.xlu0 %v3277_v56, %s2441_s26 }
 0x152   : > { %1893 = vrot.lane.b32.xlu1 %v3275_v55, %s2442_s25 }
 0x153   : > { %1891 = vrot.lane.b32.xlu0 %v3277_v56, %s2442_s25 }
 0x156   : > { %1479 = vrot.lane.b32.xlu1 %v1400_v29, %s2443_s29 }
 0x157   : > { %1477 = vrot.lane.b32.xlu0 %v1399_v32, %s2443_s29 }
 0x15a   : > { %1707 = vrot.lane.b32.xlu1 %v3296_v2, %s2441_s26 }
 0x15b   : > { %1705 = vrot.lane.b32.xlu0 %v3298_v6, %s2441_s26 }
 0x15c   : > { %v1668_v36 = vpop.permute.xlu1 %1667 }
 0x15d   : > { %2185 = vst.msk [vmem:[%s2773_s15 + $0x21] sm:$0xff] %vm344_vm1, %v1668_v36  ;;  %v1666_v40 = vpop.permute.xlu0 %1665 }
 0x15e   : > { %2184 = vst.msk [vmem:[%s2773_s15 + $0x19] sm:$0xff] %vm344_vm1, %v1666_v40  ;;  %1897 = vrot.lane.b32.xlu1 %v3296_v2, %s2442_s25  ;;  %v1404_v2 = vmax.f32 %v3332_v7, 0.0 }
 0x15f   : > { %1895 = vrot.lane.b32.xlu0 %v3298_v6, %s2442_s25  ;;  %v1403_v6 = vmax.f32 %v3341_v3, 0.0 }
 0x160   : > { %v1858_v47 = vpop.permute.xlu1 %1857 }
 0x161   : > { %2217 = vst.msk [vmem:[%s2778_s18 + $0x3a] sm:$0xff] %vm344_vm1, %v1858_v47  ;;  %v1856_v52 = vpop.permute.xlu0 %1855 }
 0x162   : > { %2216 = vst.msk [vmem:[%s2778_s18 + $0x32] sm:$0xff] %vm344_vm1, %v1856_v52  ;;  %1483 = vrot.lane.b32.xlu1 %v1402_v43, %s2443_s29 }
 0x163   : > { %1481 = vrot.lane.b32.xlu0 %v1401_v44, %s2443_s29 }
 0x164   : > { %v1672_v55 = vpop.permute.xlu1 %1671 }
 0x165   : > { %2187 = vst.msk [vmem:[%s2773_s15 + $0x39] sm:$0xff] %vm344_vm1, %v1672_v55  ;;  %v1670_v56 = vpop.permute.xlu0 %1669 }
 0x166   : > { %2186 = vst.msk [vmem:[%s2773_s15 + $0x31] sm:$0xff] %vm344_vm1, %v1670_v56  ;;  %1711 = vrot.lane.b32.xlu1 %v3322_v23, %s2441_s26 }
 0x167   : > { %1709 = vrot.lane.b32.xlu0 %v3324_v24, %s2441_s26 }
 0x168   : > { %v1862_v60 = vpop.permute.xlu1 %1861 }
 0x169   : > { %2219 = vst.msk [vmem:[%s2778_s18 + $0x52] sm:$0xff] %vm344_vm1, %v1862_v60  ;;  %v1860_v0 = vpop.permute.xlu0 %1859 }
 0x16a   : > { %2218 = vst.msk [vmem:[%s2778_s18 + $0x4a] sm:$0xff] %vm344_vm1, %v1860_v0  ;;  %1901 = vrot.lane.b32.xlu1 %v3322_v23, %s2442_s25 }
 0x16b   : > { %1899 = vrot.lane.b32.xlu0 %v3324_v24, %s2442_s25 }
 0x16c   : > { %v1676_v10 = vpop.permute.xlu1 %1675 }
 0x16d   : > { %2189 = vst.msk [vmem:[%s2773_s15 + $0x51] sm:$0xff] %vm344_vm1, %v1676_v10  ;;  %v1452_v5 = vpop.permute.xlu0 %1451 }
 0x16e   : > { %1547 = vst.msk [vmem:[%s3133_s23 + $0x8] sm:$0xff] %vm1545_vm7, %v1452_v5  ;;  %1487 = vrot.lane.b32.xlu1 %v1404_v2, %s2443_s29 }
 0x16f   : > { %1485 = vrot.lane.b32.xlu0 %v1403_v6, %s2443_s29 }
 0x170   : > { %v1866_v23 = vpop.permute.xlu1 %1865 }
 0x171   : > { %2221 = vst.msk [vmem:[%s2778_s18 + $0x6a] sm:$0xff] %vm344_vm1, %v1866_v23  ;;  %v1674_v7 = vpop.permute.xlu0 %1673 }
 0x172   : > { %2188 = vst.msk [vmem:[%s2773_s15 + $0x49] sm:$0xff] %vm344_vm1, %v1674_v7  ;;  %1715 = vrot.lane.b32.xlu1 %v3344_v38, %s2441_s26 }
 0x173   : > { %1713 = vrot.lane.b32.xlu0 %v3346_v39, %s2441_s26 }
 0x174   : > { %v1680_v24 = vpop.permute.xlu1 %1679 }
 0x175   : > { %2191 = vst.msk [vmem:[%s2773_s15 + $0x69] sm:$0xff] %vm344_vm1, %v1680_v24  ;;  %v1864_v3 = vpop.permute.xlu0 %1863 }
 0x176   : > { %2220 = vst.msk [vmem:[%s2778_s18 + $0x62] sm:$0xff] %vm344_vm1, %v1864_v3  ;;  %1905 = vrot.lane.b32.xlu1 %v3344_v38, %s2442_s25 }
 0x177   : > { %1903 = vrot.lane.b32.xlu0 %v3346_v39, %s2442_s25 }
 0x178   : > { %v1870_v17 = vpop.permute.xlu1 %1869 }
 0x179   : > { %2223 = vst.msk [vmem:[%s2778_s18 + $0x82] sm:$0xff] %vm344_vm1, %v1870_v17  ;;  %v1450_v18 = vpop.permute.xlu0 %1449 }
 0x17a   : > { %1546 = vst.msk [vmem:[%s3133_s23] sm:$0xff] %vm1545_vm7, %v1450_v18  ;;  %1491 = vrot.lane.b32.xlu1 %v1406_v9, %s2443_s29 }
 0x17b   : > { %1489 = vrot.lane.b32.xlu0 %v1405_v59, %s2443_s29 }
 0x17c   : > { %v1456_v4 = vpop.permute.xlu1 %1455 }
 0x17d   : > { %1549 = vst.msk [vmem:[%s3133_s23 + $0x18] sm:$0xff] %vm1545_vm7, %v1456_v4  ;;  %v1678_v38 = vpop.permute.xlu0 %1677 }
 0x17e   : > { %2190 = vst.msk [vmem:[%s2773_s15 + $0x61] sm:$0xff] %vm344_vm1, %v1678_v38  ;;  %1719 = vrot.lane.b32.xlu1 %v3364_v53, %s2441_s26 }
 0x17f   : > { %1717 = vrot.lane.b32.xlu0 %v3366_v54, %s2441_s26 }
 0x180   : > { %v1454_v39 = vpop.permute.xlu1 %1453 }
 0x181   : > { %1548 = vst.msk [vmem:[%s3133_s23 + $0x10] sm:$0xff] %vm1545_vm7, %v1454_v39  ;;  %v1868_v50 = vpop.permute.xlu0 %1867 }
 0x182   : > { %2222 = vst.msk [vmem:[%s2778_s18 + $0x7a] sm:$0xff] %vm344_vm1, %v1868_v50  ;;  %1909 = vrot.lane.b32.xlu1 %v3364_v53, %s2442_s25 }
 0x183   : > { %1907 = vrot.lane.b32.xlu0 %v3366_v54, %s2442_s25 }
 0x184   : > { %v1684_v27 = vpop.permute.xlu1 %1683 }
 0x185   : > { %2193 = vst.msk [vmem:[%s2773_s15 + $0x81] sm:$0xff] %vm344_vm1, %v1684_v27  ;;  %v1682_v28 = vpop.permute.xlu0 %1681 }
 0x186   : > { %2192 = vst.msk [vmem:[%s2773_s15 + $0x79] sm:$0xff] %vm344_vm1, %v1682_v28  ;;  %1495 = vrot.lane.b32.xlu1 %v1408_v20, %s2443_s29 }
 0x187   : > { %1493 = vrot.lane.b32.xlu0 %v1407_v26, %s2443_s29 }
 0x188   : > { %v1874_v62 = vpop.permute.xlu1 %1873 }
 0x189   : > { %2225 = vst.msk [vmem:[%s2778_s18 + $0x9a] sm:$0xff] %vm344_vm1, %v1874_v62  ;;  %v1872_v53 = vpop.permute.xlu0 %1871 }
 0x18a   : > { %2224 = vst.msk [vmem:[%s2778_s18 + $0x92] sm:$0xff] %vm344_vm1, %v1872_v53  ;;  %1723 = vrot.lane.b32.xlu1 %v3390_v14, %s2441_s26 }
 0x18b   : > { %1721 = vrot.lane.b32.xlu0 %v3392_v16, %s2441_s26 }
 0x18c   : > { %v1460_v54 = vpop.permute.xlu1 %1459 }
 0x18d   : > { %1551 = vst.msk [vmem:[%s3133_s23 + $0x28] sm:$0xff] %vm1545_vm7, %v1460_v54  ;;  %v1458_v13 = vpop.permute.xlu0 %1457 }
 0x18e   : > { %1550 = vst.msk [vmem:[%s3133_s23 + $0x20] sm:$0xff] %vm1545_vm7, %v1458_v13  ;;  %1913 = vrot.lane.b32.xlu1 %v3390_v14, %s2442_s25 }
 0x18f   : > { %1911 = vrot.lane.b32.xlu0 %v3392_v16, %s2442_s25  ;;  %v1411_v16 = vmax.f32 %v3428_v31, 0.0 }
 0x190   : > { %v1688_v37 = vpop.permute.xlu1 %1687 }
 0x191   : > { %2195 = vst.msk [vmem:[%s2773_s15 + $0x99] sm:$0xff] %vm344_vm1, %v1688_v37  ;;  %v1686_v41 = vpop.permute.xlu0 %1685 }
 0x192   : > { %2194 = vst.msk [vmem:[%s2773_s15 + $0x91] sm:$0xff] %vm344_vm1, %v1686_v41  ;;  %1499 = vrot.lane.b32.xlu1 %v1410_v30, %s2443_s29 }
 0x193   : > { %1497 = vrot.lane.b32.xlu0 %v1409_v33, %s2443_s29 }
 0x194   : > { %v1878_v15 = vpop.permute.xlu1 %1877 }
 0x195   : > { %2227 = vst.msk [vmem:[%s2778_s18 + $0xb2] sm:$0xff] %vm344_vm1, %v1878_v15  ;;  %v1876_v14 = vpop.permute.xlu0 %1875 }
 0x196   : > { %2226 = vst.msk [vmem:[%s2778_s18 + $0xaa] sm:$0xff] %vm344_vm1, %v1876_v14  ;;  %1727 = vrot.lane.b32.xlu1 %v3412_v34, %s2441_s26 }
 0x197   : > { %1725 = vrot.lane.b32.xlu0 %v3414_v35, %s2441_s26 }
 0x198   : > { %v1464_v42 = vpop.permute.xlu1 %1463 }
 0x199   : > { %1553 = vst.msk [vmem:[%s3133_s23 + $0x38] sm:$0xff] %vm1545_vm7, %v1464_v42  ;;  %v1462_v45 = vpop.permute.xlu0 %1461 }
 0x19a   : > { %1552 = vst.msk [vmem:[%s3133_s23 + $0x30] sm:$0xff] %vm1545_vm7, %v1462_v45  ;;  %1503 = vrot.lane.b32.xlu1 %v1412_v11, %s2443_s29 }
 0x19b   : > { %1501 = vrot.lane.b32.xlu0 %v1411_v16, %s2443_s29 }
 0x19c   : > { %v1692_v31 = vpop.permute.xlu1 %1691 }
 0x19d   : > { %2197 = vst.msk [vmem:[%s2773_s15 + $0xb1] sm:$0xff] %vm344_vm1, %v1692_v31  ;;  %v1690_v51 = vpop.permute.xlu0 %1689 }
 0x19e   : > { %2196 = vst.msk [vmem:[%s2773_s15 + $0xa9] sm:$0xff] %vm344_vm1, %v1690_v51  ;;  %1507 = vrot.lane.b32.xlu1 %v1414_v48, %s2443_s29 }
 0x19f   : > { %1505 = vrot.lane.b32.xlu0 %v1413_v12, %s2443_s29 }
 0x1a0   : > { %v1882_v57 = vpop.permute.xlu1 %1881 }
 0x1a1   : > { %2229 = vst.msk [vmem:[%s2778_s18 + $0xca] sm:$0xff] %vm344_vm1, %v1882_v57  ;;  %v1880_v61 = vpop.permute.xlu0 %1879 }
 0x1a2   : > { %2228 = vst.msk [vmem:[%s2778_s18 + $0xc2] sm:$0xff] %vm344_vm1, %v1880_v61  ;;  %1511 = vrot.lane.b32.xlu1 %v1416_v58, %s2443_s29 }
 0x1a3   : > { %1509 = vrot.lane.b32.xlu0 %v1415_v46, %s2443_s29 }
 0x1a4   : > { %v1468_v22 = vpop.permute.xlu1 %1467 }
 0x1a5   : > { %1555 = vst.msk [vmem:[%s3133_s23 + $0x48] sm:$0xff] %vm1545_vm7, %v1468_v22  ;;  %v1466_v63 = vpop.permute.xlu0 %1465 }
 0x1a6   : > { %1554 = vst.msk [vmem:[%s3133_s23 + $0x40] sm:$0xff] %vm1545_vm7, %v1466_v63  ;;  %1917 = vrot.lane.b32.xlu1 %v3412_v34, %s2442_s25 }
 0x1a7   : > { %1915 = vrot.lane.b32.xlu0 %v3414_v35, %s2442_s25 }
 0x1a8   : > { %v1696_v1 = vpop.permute.xlu1 %1695 }
 0x1a9   : > { %2199 = vst.msk [vmem:[%s2773_s15 + $0xc9] sm:$0xff] %vm344_vm1, %v1696_v1  ;;  %v1694_v8 = vpop.permute.xlu0 %1693 }
 0x1aa   : > { %2198 = vst.msk [vmem:[%s2773_s15 + $0xc1] sm:$0xff] %vm344_vm1, %v1694_v8 }
 0x1ac   : > { %v1886_v19 = vpop.permute.xlu1 %1885 }
 0x1ad   : > { %2231 = vst.msk [vmem:[%s2778_s18 + $0xe2] sm:$0xff] %vm344_vm1, %v1886_v19  ;;  %v1884_v21 = vpop.permute.xlu0 %1883 }
 0x1ae   : > { %2230 = vst.msk [vmem:[%s2778_s18 + $0xda] sm:$0xff] %vm344_vm1, %v1884_v21 }
 0x1b0   : > { %v1472_v34 = vpop.permute.xlu1 %1471 }
 0x1b1   : > { %1557 = vst.msk [vmem:[%s3133_s23 + $0x58] sm:$0xff] %vm1545_vm7, %v1472_v34  ;;  %v1470_v35 = vpop.permute.xlu0 %1469 }
 0x1b2   : > { %1556 = vst.msk [vmem:[%s3133_s23 + $0x50] sm:$0xff] %vm1545_vm7, %v1470_v35 }
 0x1b4   : > { %v1700_v49 = vpop.permute.xlu1 %1699 }
 0x1b5   : > { %2201 = vst.msk [vmem:[%s2773_s15 + $0xe1] sm:$0xff] %vm344_vm1, %v1700_v49  ;;  %v1698_v25 = vpop.permute.xlu0 %1697 }
 0x1b6   : > { %2200 = vst.msk [vmem:[%s2773_s15 + $0xd9] sm:$0xff] %vm344_vm1, %v1698_v25 }
 0x1b8   : > { %v1890_v29 = vpop.permute.xlu1 %1889 }
 0x1b9   : > { %2233 = vst.msk [vmem:[%s2778_s18 + $0xfa] sm:$0xff] %vm344_vm1, %v1890_v29  ;;  %v1888_v32 = vpop.permute.xlu0 %1887 }
 0x1ba   : > { %2232 = vst.msk [vmem:[%s2778_s18 + $0xf2] sm:$0xff] %vm344_vm1, %v1888_v32 }
 0x1bc   : > { %v1476_v36 = vpop.permute.xlu1 %1475 }
 0x1bd   : > { %1559 = vst.msk [vmem:[%s3133_s23 + $0x68] sm:$0xff] %vm1545_vm7, %v1476_v36  ;;  %v1474_v40 = vpop.permute.xlu0 %1473 }
 0x1be   : > { %1558 = vst.msk [vmem:[%s3133_s23 + $0x60] sm:$0xff] %vm1545_vm7, %v1474_v40 }
 0x1c0   : > { %v1704_v43 = vpop.permute.xlu1 %1703 }
 0x1c1   : > { %2203 = vst.msk [vmem:[%s2773_s15 + $0xf9] sm:$0xff] %vm344_vm1, %v1704_v43  ;;  %v1702_v44 = vpop.permute.xlu0 %1701 }
 0x1c2   : > { %2202 = vst.msk [vmem:[%s2773_s15 + $0xf1] sm:$0xff] %vm344_vm1, %v1702_v44 }
 0x1c4   : > { %v1894_v47 = vpop.permute.xlu1 %1893 }
 0x1c5   : > { %2235 = vst.msk [vmem:[%s2778_s18 + $0x112] sm:$0xff] %vm344_vm1, %v1894_v47  ;;  %v1892_v52 = vpop.permute.xlu0 %1891 }
 0x1c6   : > { %2234 = vst.msk [vmem:[%s2778_s18 + $0x10a] sm:$0xff] %vm344_vm1, %v1892_v52 }
 0x1c8   : > { %v1480_v55 = vpop.permute.xlu1 %1479 }
 0x1c9   : > { %1561 = vst.msk [vmem:[%s3133_s23 + $0x78] sm:$0xff] %vm1545_vm7, %v1480_v55  ;;  %v1478_v56 = vpop.permute.xlu0 %1477 }
 0x1ca   : > { %1560 = vst.msk [vmem:[%s3133_s23 + $0x70] sm:$0xff] %vm1545_vm7, %v1478_v56 }
 0x1cc   : > { %v1708_v60 = vpop.permute.xlu1 %1707 }
 0x1cd   : > { %2205 = vst.msk [vmem:[%s2773_s15 + $0x111] sm:$0xff] %vm344_vm1, %v1708_v60  ;;  %v1706_v0 = vpop.permute.xlu0 %1705 }
 0x1ce   : > { %2204 = vst.msk [vmem:[%s2773_s15 + $0x109] sm:$0xff] %vm344_vm1, %v1706_v0 }
 0x1d0   : > { %v1898_v2 = vpop.permute.xlu1 %1897 }
 0x1d1   : > { %2237 = vst.msk [vmem:[%s2778_s18 + $0x12a] sm:$0xff] %vm344_vm1, %v1898_v2  ;;  %v1896_v6 = vpop.permute.xlu0 %1895 }
 0x1d2   : > { %2236 = vst.msk [vmem:[%s2778_s18 + $0x122] sm:$0xff] %vm344_vm1, %v1896_v6 }
 0x1d4   : > { %v1484_v10 = vpop.permute.xlu1 %1483 }
 0x1d5   : > { %1563 = vst.msk [vmem:[%s3133_s23 + $0x88] sm:$0xff] %vm1545_vm7, %v1484_v10  ;;  %v1482_v5 = vpop.permute.xlu0 %1481 }
 0x1d6   : > { %1562 = vst.msk [vmem:[%s3133_s23 + $0x80] sm:$0xff] %vm1545_vm7, %v1482_v5 }
 0x1d8   : > { %v1712_v23 = vpop.permute.xlu1 %1711 }
 0x1d9   : > { %2207 = vst.msk [vmem:[%s2773_s15 + $0x129] sm:$0xff] %vm344_vm1, %v1712_v23  ;;  %v1710_v7 = vpop.permute.xlu0 %1709 }
 0x1da   : > { %2206 = vst.msk [vmem:[%s2773_s15 + $0x121] sm:$0xff] %vm344_vm1, %v1710_v7 }
 0x1dc   : > { %v1902_v24 = vpop.permute.xlu1 %1901 }
 0x1dd   : > { %2239 = vst.msk [vmem:[%s2778_s18 + $0x142] sm:$0xff] %vm344_vm1, %v1902_v24  ;;  %v1900_v3 = vpop.permute.xlu0 %1899 }
 0x1de   : > { %2238 = vst.msk [vmem:[%s2778_s18 + $0x13a] sm:$0xff] %vm344_vm1, %v1900_v3 }
 0x1e0   : > { %v1488_v9 = vpop.permute.xlu1 %1487 }
 0x1e1   : > { %1565 = vst.msk [vmem:[%s3133_s23 + $0x98] sm:$0xff] %vm1545_vm7, %v1488_v9  ;;  %v1486_v59 = vpop.permute.xlu0 %1485 }
 0x1e2   : > { %1564 = vst.msk [vmem:[%s3133_s23 + $0x90] sm:$0xff] %vm1545_vm7, %v1486_v59 }
 0x1e4   : > { %v1716_v17 = vpop.permute.xlu1 %1715 }
 0x1e5   : > { %2209 = vst.msk [vmem:[%s2773_s15 + $0x141] sm:$0xff] %vm344_vm1, %v1716_v17  ;;  %v1714_v18 = vpop.permute.xlu0 %1713 }
 0x1e6   : > { %2208 = vst.msk [vmem:[%s2773_s15 + $0x139] sm:$0xff] %vm344_vm1, %v1714_v18 }
 0x1e8   : > { %v1906_v4 = vpop.permute.xlu1 %1905 }
 0x1e9   : > { %2241 = vst.msk [vmem:[%s2778_s18 + $0x15a] sm:$0xff] %vm344_vm1, %v1906_v4  ;;  %v1904_v38 = vpop.permute.xlu0 %1903 }
 0x1ea   : > { %2240 = vst.msk [vmem:[%s2778_s18 + $0x152] sm:$0xff] %vm344_vm1, %v1904_v38 }
 0x1ec   : > { %v1492_v39 = vpop.permute.xlu1 %1491 }
 0x1ed   : > { %1567 = vst.msk [vmem:[%s3133_s23 + $0xa8] sm:$0xff] %vm1545_vm7, %v1492_v39  ;;  %v1490_v50 = vpop.permute.xlu0 %1489 }
 0x1ee   : > { %1566 = vst.msk [vmem:[%s3133_s23 + $0xa0] sm:$0xff] %vm1545_vm7, %v1490_v50 }
 0x1f0   : > { %v1720_v20 = vpop.permute.xlu1 %1719 }
 0x1f1   : > { %2211 = vst.msk [vmem:[%s2773_s15 + $0x159] sm:$0xff] %vm344_vm1, %v1720_v20  ;;  %v1718_v26 = vpop.permute.xlu0 %1717 }
 0x1f2   : > { %2210 = vst.msk [vmem:[%s2773_s15 + $0x151] sm:$0xff] %vm344_vm1, %v1718_v26 }
 0x1f4   : > { %v1910_v27 = vpop.permute.xlu1 %1909 }
 0x1f5   : > { %2243 = vst.msk [vmem:[%s2778_s18 + $0x172] sm:$0xff] %vm344_vm1, %v1910_v27  ;;  %v1908_v28 = vpop.permute.xlu0 %1907 }
 0x1f6   : > { %2242 = vst.msk [vmem:[%s2778_s18 + $0x16a] sm:$0xff] %vm344_vm1, %v1908_v28 }
 0x1f8   : > { %v1496_v62 = vpop.permute.xlu1 %1495 }
 0x1f9   : > { %1569 = vst.msk [vmem:[%s3133_s23 + $0xb8] sm:$0xff] %vm1545_vm7, %v1496_v62  ;;  %v1494_v53 = vpop.permute.xlu0 %1493 }
 0x1fa   : > { %1568 = vst.msk [vmem:[%s3133_s23 + $0xb0] sm:$0xff] %vm1545_vm7, %v1494_v53 }
 0x1fc   : > { %v1724_v54 = vpop.permute.xlu1 %1723 }
 0x1fd   : > { %2213 = vst.msk [vmem:[%s2773_s15 + $0x171] sm:$0xff] %vm344_vm1, %v1724_v54  ;;  %v1722_v13 = vpop.permute.xlu0 %1721 }
 0x1fe   : > { %2212 = vst.msk [vmem:[%s2773_s15 + $0x169] sm:$0xff] %vm344_vm1, %v1722_v13 }
 0x200   : > { %v1914_v30 = vpop.permute.xlu1 %1913 }
 0x201   : > { %2245 = vst.msk [vmem:[%s2778_s18 + $0x18a] sm:$0xff] %vm344_vm1, %v1914_v30  ;;  %v1912_v33 = vpop.permute.xlu0 %1911 }
 0x202   : > { %2244 = vst.msk [vmem:[%s2778_s18 + $0x182] sm:$0xff] %vm344_vm1, %v1912_v33 }
 0x204   : > { %v1500_v37 = vpop.permute.xlu1 %1499 }
 0x205   : > { %1571 = vst.msk [vmem:[%s3133_s23 + $0xc8] sm:$0xff] %vm1545_vm7, %v1500_v37  ;;  %v1498_v41 = vpop.permute.xlu0 %1497 }
 0x206   : > { %1570 = vst.msk [vmem:[%s3133_s23 + $0xc0] sm:$0xff] %vm1545_vm7, %v1498_v41 }
 0x208   : > { %v1728_v15 = vpop.permute.xlu1 %1727 }
 0x209   : > { %2215 = vst.msk [vmem:[%s2773_s15 + $0x189] sm:$0xff] %vm344_vm1, %v1728_v15  ;;  %v1726_v14 = vpop.permute.xlu0 %1725 }
 0x20a   : > { %2214 = vst.msk [vmem:[%s2773_s15 + $0x181] sm:$0xff] %vm344_vm1, %v1726_v14 }
 0x20c   : > { %v1504_v11 = vpop.permute.xlu1 %1503 }
 0x20d   : > { %1573 = vst.msk [vmem:[%s3133_s23 + $0xd8] sm:$0xff] %vm1545_vm7, %v1504_v11  ;;  %v1502_v16 = vpop.permute.xlu0 %1501 }
 0x20e   : > { %1572 = vst.msk [vmem:[%s3133_s23 + $0xd0] sm:$0xff] %vm1545_vm7, %v1502_v16 }
 0x210   : > { %v1508_v42 = vpop.permute.xlu1 %1507 }
 0x211   : > { %1575 = vst.msk [vmem:[%s3133_s23 + $0xe8] sm:$0xff] %vm1545_vm7, %v1508_v42  ;;  %v1506_v45 = vpop.permute.xlu0 %1505 }
 0x212   : > { %1574 = vst.msk [vmem:[%s3133_s23 + $0xe0] sm:$0xff] %vm1545_vm7, %v1506_v45 }
 0x214   : > { %v1512_v48 = vpop.permute.xlu1 %1511 }
 0x215   : > { %1577 = vst.msk [vmem:[%s3133_s23 + $0xf8] sm:$0xff] %vm1545_vm7, %v1512_v48  ;;  %v1510_v12 = vpop.permute.xlu0 %1509 }
 0x216   : > { %1576 = vst.msk [vmem:[%s3133_s23 + $0xf0] sm:$0xff] %vm1545_vm7, %v1510_v12 }
 0x218   : > { %v1918_v31 = vpop.permute.xlu1 %1917 }
 0x219   : > { %2247 = vst.msk [vmem:[%s2778_s18 + $0x1a2] sm:$0xff] %vm344_vm1, %v1918_v31  ;;  %v1916_v51 = vpop.permute.xlu0 %1915 }
 0x21a   : > { %2246 = vst.msk [vmem:[%s2778_s18 + $0x19a] sm:$0xff] %vm344_vm1, %v1916_v51 }
 0x21b PF: > { %s18_s24 = sadd.s32 1, %s2438_s24  }
 0x21c   : > { %p15_p4 = scmp.ge.s32.totalorder %s18_s24, 4  }
 0x21e   :  { %17 = sbr.rel (!%p15_p4) target bundleno = 1 (0x1), region = 96 }

</bundles_post_ra>
